<compile_context>
chip_gen: v5e
topology: v5e:2x2
jax: 0.10.0
libtpu: 0.0.40
codegen_flags: <defaults>
</compile_context>

<pallas_src>
from functools import partial

import numpy as np
import jax
import jax.numpy as jnp
from jax import lax
from jax.experimental import pallas as pl
from jax.experimental.pallas import tpu as pltpu


# ----------------------------------------------------------------------------
# helpers
# ----------------------------------------------------------------------------
def _spatial_tile(total, cap=2048):
    """Largest spatial tile <= cap dividing `total`, preferring lane-aligned tiles."""
    if total <= cap:
        return total
    for t in range(cap, 127, -1):
        if total % t == 0 and t % 128 == 0:
            return t
    return total


def _make_tap_masks(hs, ws, dtype):
    """(9, hs*ws) {0,1} masks: mask[kh*3+kw, p] == 1 iff the 3x3 tap's source
    pixel (row(p)+kh-1, col(p)+kw-1) lies inside the image (== zero 'same' pad)."""
    r = np.arange(hs)[:, None]
    c = np.arange(ws)[None, :]
    out = []
    for kh in range(3):
        for kw in range(3):
            dr, dc = kh - 1, kw - 1
            m = (r + dr >= 0) & (r + dr < hs) & (c + dc >= 0) & (c + dc < ws)
            out.append(m.reshape(-1))
    return jnp.asarray(np.stack(out).astype(np.float32), dtype=dtype)


def _pixel_shuffle_nchw(z, cin, h, w):
    """torch.nn.PixelShuffle(2) on NCHW: (N, 4*cin, h, w) -> (N, cin, 2h, 2w)."""
    n = z.shape[0]
    z = z.reshape(n, cin, 2, 2, h, w)
    z = jnp.transpose(z, (0, 1, 4, 2, 5, 3))
    return z.reshape(n, cin, 2 * h, 2 * w)


# ----------------------------------------------------------------------------
# Kernel 1: PixelShuffle_ICNR 1x1 conv + ReLU  (channels-major, lane-dense out)
# ----------------------------------------------------------------------------
def _shuffle_conv_kernel(x_ref, w_ref, b_ref, o_ref):
    # x_ref: (1, Cin, T) f32   w_ref: (4Cin, Cin) cdt   b_ref: (4Cin, 1) f32
    # o_ref: (1, 4Cin, T) cdt  (T = spatial tile on the lane axis)
    xb = x_ref[0].astype(w_ref.dtype)
    acc = jnp.dot(w_ref[...], xb, preferred_element_type=jnp.float32)
    o_ref[0] = jnp.maximum(acc + b_ref[...], 0.0).astype(o_ref.dtype)


def shuffle_conv1x1_relu(x_cm, w, b, compute_dtype):
    """1x1 conv + ReLU, channels-major: (N, Cin, HW) -> (N, 4Cin, HW)."""
    n, cin, hw = x_cm.shape
    c4 = w.shape[0]
    t = _spatial_tile(hw)
    return pl.pallas_call(
        _shuffle_conv_kernel,
        out_shape=jax.ShapeDtypeStruct((n, c4, hw), compute_dtype),
        grid_spec=pltpu.PrefetchScalarGridSpec(
            num_scalar_prefetch=0,
            grid=(n, hw // t),
            in_specs=[
                pl.BlockSpec((1, cin, t), lambda bi, si: (bi, 0, si)),
                pl.BlockSpec((c4, cin), lambda bi, si: (0, 0)),
                pl.BlockSpec((c4, 1), lambda bi, si: (0, 0)),
            ],
            out_specs=pl.BlockSpec((1, c4, t), lambda bi, si: (bi, 0, si)),
        ),
        compiler_params=pltpu.CompilerParams(
            dimension_semantics=("parallel", "parallel")),
    )(x_cm, w, b)


# ----------------------------------------------------------------------------
# Kernel 2: fused  concat(skip) + conv3x3/BN/ReLU + conv3x3/BN/ReLU
# ----------------------------------------------------------------------------
def _fused_double_conv_kernel(u_ref, s_ref, m_ref, w1_ref, a1_ref, b1_ref,
                              w2_ref, a2_ref, b2_ref, o_ref, pad_ref, patch_ref,
                              *, cin, cskip, cout, ws, s_len):
    c1 = cin + cskip
    ws1 = ws + 1
    masks = m_ref[...]                                        # (9, S)

    # Zero the left/right halo bands of the flattened padded scratch once.
    zband = jnp.zeros((pad_ref.shape[0], ws1), pad_ref.dtype)
    pad_ref[:, 0:ws1] = zband
    pad_ref[:, ws1 + s_len:ws1 + s_len + ws1] = zband

    def conv3x3(c, w_ref_, scale_ref, bias_ref):
        # im2col: 9 shifted, boundary-masked views -> ONE (Cout,9c)@(9c,S) matmul.
        for t in range(9):
            kh, kw = t // 3, t % 3
            sft = (kh - 1) * ws + (kw - 1)
            sl = pad_ref[0:c, ws1 + sft:ws1 + sft + s_len]    # (c, S)
            patch_ref[t * c:(t + 1) * c, :] = sl * masks[t:t + 1]
        acc = jnp.dot(w_ref_[...], patch_ref[0:9 * c, :],
                      preferred_element_type=jnp.float32)     # (Cout, S) f32
        # folded-BN scale/bias + ReLU epilogue stays in f32
        return jnp.maximum(acc * scale_ref[...] + bias_ref[...], 0.0)

    # conv1: channel concat(upsampled, skip) folded into two scratch stores.
    pad_ref[0:cin, ws1:ws1 + s_len] = u_ref[0].astype(pad_ref.dtype)
    pad_ref[cin:c1, ws1:ws1 + s_len] = s_ref[0].astype(pad_ref.dtype)
    y1 = conv3x3(c1, w1_ref, a1_ref, b1_ref)

    # conv2: the intermediate activation never leaves VMEM.
    pad_ref[0:cout, ws1:ws1 + s_len] = y1.astype(pad_ref.dtype)
    y2 = conv3x3(cout, w2_ref, a2_ref, b2_ref)
    o_ref[0] = y2.astype(o_ref.dtype)                         # lane-dense store


def fused_double_conv(u, sk, masks, w1t, s1, b1, w2t, s2, b2, ws, compute_dtype):
    n, cin, s_len = u.shape
    cskip = sk.shape[1]
    c1 = cin + cskip
    cout = w1t.shape[0]
    cmax = max(c1, cout)
    ws1 = ws + 1
    itemsize = jnp.dtype(compute_dtype).itemsize

    kernel = partial(_fused_double_conv_kernel, cin=cin, cskip=cskip,
                     cout=cout, ws=ws, s_len=s_len)
    flops = int(2 * n * s_len * 9 * (c1 * cout + cout * cout))
    bytes_accessed = int(n * s_len * (cin * itemsize + cskip * 4 + cout * 4)
                         + 9 * s_len * itemsize
                         + 9 * cout * (c1 + cout) * itemsize + 4 * cout * 4)

    return pl.pallas_call(
        kernel,
        out_shape=jax.ShapeDtypeStruct((n, cout, s_len), jnp.float32),
        grid_spec=pltpu.PrefetchScalarGridSpec(
            num_scalar_prefetch=0,
            grid=(n,),
            in_specs=[
                pl.BlockSpec((1, cin, s_len), lambda bi: (bi, 0, 0)),
                pl.BlockSpec((1, cskip, s_len), lambda bi: (bi, 0, 0)),
                pl.BlockSpec((9, s_len), lambda bi: (0, 0)),
                pl.BlockSpec((cout, 9 * c1), lambda bi: (0, 0)),
                pl.BlockSpec((cout, 1), lambda bi: (0, 0)),
                pl.BlockSpec((cout, 1), lambda bi: (0, 0)),
                pl.BlockSpec((cout, 9 * cout), lambda bi: (0, 0)),
                pl.BlockSpec((cout, 1), lambda bi: (0, 0)),
                pl.BlockSpec((cout, 1), lambda bi: (0, 0)),
            ],
            out_specs=pl.BlockSpec((1, cout, s_len), lambda bi: (bi, 0, 0)),
            scratch_shapes=[
                pltpu.VMEM((cmax, s_len + 2 * ws1), compute_dtype),  # padded act
                pltpu.VMEM((9 * cmax, s_len), compute_dtype),        # im2col patches
            ],
        ),
        compiler_params=pltpu.CompilerParams(dimension_semantics=("parallel",)),
        cost_estimate=pl.CostEstimate(flops=flops, transcendentals=0,
                                      bytes_accessed=bytes_accessed),
    )(u, sk, masks, w1t, s1, b1, w2t, s2, b2)


# ----------------------------------------------------------------------------
# Parameters (deterministic synthetic init; BN eval stats folded)
# ----------------------------------------------------------------------------
def init_params(key, in_ch, skip_ch, out_ch, eps=1e-5):
    ks = jax.random.split(key, 8)
    c1_in = in_ch + skip_ch
    # PixelShuffle_ICNR 1x1 conv: (out=4*in_ch, in=in_ch) + bias
    w_shuf = 0.1 * jax.random.normal(ks[0], (4 * in_ch, in_ch), jnp.float32)
    b_shuf = 0.1 * jax.random.normal(ks[1], (4 * in_ch,), jnp.float32)
    # conv1 3x3 (HWIO), no conv bias (use_batchnorm=True); fold eval-mode BN.
    w1 = 0.1 * jax.random.normal(ks[2], (3, 3, c1_in, out_ch), jnp.float32)
    g1 = 1.0 + 0.1 * jax.random.normal(ks[3], (out_ch,), jnp.float32)
    bt1 = 0.1 * jax.random.normal(ks[4], (out_ch,), jnp.float32)
    m1 = jnp.zeros((out_ch,), jnp.float32)
    v1 = jnp.ones((out_ch,), jnp.float32)
    s1 = g1 / jnp.sqrt(v1 + eps)
    bb1 = bt1 - m1 * s1
    # conv2 3x3
    w2 = 0.1 * jax.random.normal(ks[5], (3, 3, out_ch, out_ch), jnp.float32)
    g2 = 1.0 + 0.1 * jax.random.normal(ks[6], (out_ch,), jnp.float32)
    bt2 = 0.1 * jax.random.normal(ks[7], (out_ch,), jnp.float32)
    m2 = jnp.zeros((out_ch,), jnp.float32)
    v2 = jnp.ones((out_ch,), jnp.float32)
    s2 = g2 / jnp.sqrt(v2 + eps)
    bb2 = bt2 - m2 * s2

    def to_tap_major(w_hwio):
        # (3,3,Ci,Co) -> (Co, 9*Ci): rows ordered (kh,kw)-major, ci-minor,
        # matching the kernel's im2col patch layout.
        co = w_hwio.shape[-1]
        return jnp.transpose(w_hwio, (3, 0, 1, 2)).reshape(co, -1)

    return dict(
        w_shuf=w_shuf, b_shuf=b_shuf.reshape(-1, 1),
        w1=w1, w2=w2,                                    # raw HWIO (reference)
        w1t=to_tap_major(w1), w2t=to_tap_major(w2),      # kernel layout
        s1=s1.reshape(-1, 1), b1=bb1.reshape(-1, 1),
        s2=s2.reshape(-1, 1), b2=bb2.reshape(-1, 1),
    )


# ----------------------------------------------------------------------------
# DecoderBlock forward: 2 Pallas kernels + one (unavoidable) XLA shuffle copy
# ----------------------------------------------------------------------------
def decoder_block_forward(x_nchw, skip_nchw, p, compute_dtype=jnp.bfloat16):
    cdt = compute_dtype
    n, cin, h, w = x_nchw.shape
    cskip = skip_nchw.shape[1]
    cout = p["w1t"].shape[0]
    hs, ws = 2 * h, 2 * w
    s_len = hs * ws

    # PixelShuffle_ICNR: 1x1 conv + ReLU (Pallas, lane-dense, tiled) ...
    z = shuffle_conv1x1_relu(x_nchw.reshape(n, cin, h * w),
                             p["w_shuf"].astype(cdt), p["b_shuf"], cdt)
    # ... then the shuffle placement itself (one XLA copy).
    # TODO(synk): fusing the interleaved pixel-shuffle scatter into the Pallas
    # store needs lane-strided writes; it is left as a single XLA copy.
    u = _pixel_shuffle_nchw(z.reshape(n, 4 * cin, h, w), cin, h, w)
    # TODO(synk): PixelShuffle_ICNR blur branch (ReplicationPad+AvgPool) not
    # implemented (module default blur=False).

    # attention1 / attention2 are Identity for attention_type=None.
    masks = _make_tap_masks(hs, ws, cdt)
    out = fused_double_conv(u.reshape(n, cin, s_len),
                            skip_nchw.reshape(n, cskip, s_len),
                            masks,
                            p["w1t"].astype(cdt), p["s1"], p["b1"],
                            p["w2t"].astype(cdt), p["s2"], p["b2"],
                            ws, cdt)
    # TODO(synk): for v7x-scale images add a row-strip grid axis (halo handled
    # by the tap masks) so each block fits 64 MiB VMEM and both TensorCores are
    # busy even at N=1.
    return out.reshape(n, cout, hs, ws)


# ----------------------------------------------------------------------------
# Pure-JAX NCHW reference (mirrors the kernels' quantization points)
# ----------------------------------------------------------------------------
def ref_forward(x, skip, p, compute_dtype):
    dn = ("NCHW", "OIHW", "NCHW")
    cdt, f32 = compute_dtype, jnp.float32
    in_ch = p["w_shuf"].shape[1]
    w_shuf = p["w_shuf"].astype(cdt).reshape(4 * in_ch, in_ch, 1, 1)
    y = lax.conv_general_dilated(x.astype(cdt), w_shuf, (1, 1), "VALID",
                                 dimension_numbers=dn, preferred_element_type=f32)
    y = jnp.maximum(y + p["b_shuf"].reshape(1, -1, 1, 1), 0.0).astype(cdt)
    n, _, h, w = y.shape
    y = y.reshape(n, in_ch, 2, 2, h, w).transpose(0, 1, 4, 2, 5, 3)
    y = y.reshape(n, in_ch, 2 * h, 2 * w)
    y = jnp.concatenate([y, skip.astype(cdt)], axis=1)
    w1 = jnp.transpose(p["w1"], (3, 2, 0, 1)).astype(cdt)
    y = lax.conv_general_dilated(y, w1, (1, 1), ((1, 1), (1, 1)),
                                 dimension_numbers=dn, preferred_element_type=f32)
    y = jnp.maximum(y * p["s1"].reshape(1, -1, 1, 1)
                    + p["b1"].reshape(1, -1, 1, 1), 0.0).astype(cdt)
    w2 = jnp.transpose(p["w2"], (3, 2, 0, 1)).astype(cdt)
    y = lax.conv_general_dilated(y, w2, (1, 1), ((1, 1), (1, 1)),
                                 dimension_numbers=dn, preferred_element_type=f32)
    y = jnp.maximum(y * p["s2"].reshape(1, -1, 1, 1)
                    + p["b2"].reshape(1, -1, 1, 1), 0.0)
    return y


if __name__ == "__main__":
    key = jax.random.PRNGKey(0)
    k1, k2, k3 = jax.random.split(key, 3)

    N, IN_CH, SKIP_CH, OUT_CH, H, W = 2, 4, 4, 8, 16, 16
    x = jax.random.normal(k1, (N, IN_CH, H, W), jnp.float32)
    skip = jax.random.normal(k2, (N, SKIP_CH, 2 * H, 2 * W), jnp.float32)
    params = init_params(k3, IN_CH, SKIP_CH, OUT_CH)

    # Strict correctness check: f32 operands end-to-end.
    fwd_f32 = jax.jit(partial(decoder_block_forward, compute_dtype=jnp.float32))
    out32 = jax.block_until_ready(fwd_f32(x, skip, params))
    assert out32.shape == (N, OUT_CH, 2 * H, 2 * W), out32.shape
    ref32 = ref_forward(x, skip, params, jnp.float32)
    np.testing.assert_allclose(np.asarray(out32), np.asarray(ref32),
                               rtol=1e-4, atol=1e-4)

    # Performance configuration (v6e/v7x): bf16 MXU operands, f32 accumulation
    # and f32 BN/ReLU epilogues; checked against a bf16-mirrored reference.
    fwd_bf16 = jax.jit(partial(decoder_block_forward, compute_dtype=jnp.bfloat16))
    out16 = jax.block_until_ready(fwd_bf16(x, skip, params))
    ref16 = ref_forward(x, skip, params, jnp.bfloat16)
    np.testing.assert_allclose(np.asarray(out16), np.asarray(ref16),
                               rtol=5e-2, atol=5e-2)

    print("KERNEL_OK")
</pallas_src>

<mosaic_0001>
module attributes {stable_mosaic.version = 11 : i64} {
  func.func @_shuffle_conv_kernel(%arg0: i32, %arg1: i32, %arg2: memref<1x4x256xf32, #tpu.memory_space<vmem>>, %arg3: memref<16x4xf32, #tpu.memory_space<vmem>>, %arg4: memref<16x1xf32, #tpu.memory_space<vmem>>, %arg5: memref<1x16x256xf32, #tpu.memory_space<vmem>>) attributes {dimension_semantics = [#tpu.dimension_semantics<parallel>, #tpu.dimension_semantics<parallel>], iteration_bounds = array<i64: 2, 1>, scalar_prefetch = 0 : i64, scratch_operands = 0 : i64, tpu.core_type = #tpu.core_type<tc>, window_params = [{transform_indices = @transform_0, window_bounds = array<i64: 1, 4, 256>}, {pipeline_mode = #tpu.pipeline_mode<synchronous>, transform_indices = @transform_1, window_bounds = array<i64: 16, 4>}, {pipeline_mode = #tpu.pipeline_mode<synchronous>, transform_indices = @transform_2, window_bounds = array<i64: 16, 1>}, {transform_indices = @transform_3, window_bounds = array<i64: 1, 16, 256>}]} {
    %c0 = arith.constant 0 : index
    %c0_0 = arith.constant 0 : index
    %c0_1 = arith.constant 0 : index
    %0 = vector.load %arg2[%c0, %c0_0, %c0_1] : memref<1x4x256xf32, #tpu.memory_space<vmem>>, vector<1x4x256xf32>
    %1 = vector.shape_cast %0 : vector<1x4x256xf32> to vector<4x256xf32>
    %c0_2 = arith.constant 0 : index
    %c0_3 = arith.constant 0 : index
    %2 = vector.load %arg3[%c0_2, %c0_3] : memref<16x4xf32, #tpu.memory_space<vmem>>, vector<16x4xf32>
    %cst = arith.constant dense<0.000000e+00> : vector<16x256xf32>
    %3 = tpu.matmul %2, %1, %cst {dimension_numbers = #tpu.dot_dimension_numbers<[1], [0], [0], [1], [0, 0, 1, 1], [], []>} : vector<16x4xf32>, vector<4x256xf32>, vector<16x256xf32> -> vector<16x256xf32>
    %c0_4 = arith.constant 0 : index
    %c0_5 = arith.constant 0 : index
    %4 = vector.load %arg4[%c0_4, %c0_5] : memref<16x1xf32, #tpu.memory_space<vmem>>, vector<16x1xf32>
    %5 = vector.broadcast %4 : vector<16x1xf32> to vector<16x256xf32>
    %6 = arith.addf %3, %5 : vector<16x256xf32>
    %cst_6 = arith.constant 0.000000e+00 : f32
    %7 = vector.broadcast %cst_6 : f32 to vector<16x256xf32>
    %8 = arith.maximumf %6, %7 : vector<16x256xf32>
    %c0_7 = arith.constant 0 : index
    %c0_8 = arith.constant 0 : index
    %c0_9 = arith.constant 0 : index
    %9 = vector.load %arg5[%c0_7, %c0_8, %c0_9] : memref<1x16x256xf32, #tpu.memory_space<vmem>>, vector<1x16x256xf32>
    %10 = vector.shape_cast %9 : vector<1x16x256xf32> to vector<16x256xf32>
    %11 = vector.shape_cast %8 : vector<16x256xf32> to vector<1x16x256xf32>
    tpu.vector_store %arg5[%c0_7, %c0_8, %c0_9], %11 {strides = array<i32>} : memref<1x16x256xf32, #tpu.memory_space<vmem>>, vector<1x16x256xf32>,
    return
  }
  func.func @transform_0(%arg0: i32, %arg1: i32) -> (i32, i32, i32) {
    %c0_i32 = arith.constant 0 : i32
    %c0_i32_0 = arith.constant 0 : i32
    return %arg0, %c0_i32, %arg1 : i32, i32, i32
  }
  func.func @transform_1(%arg0: i32, %arg1: i32) -> (i32, i32) {
    %c0_i32 = arith.constant 0 : i32
    %c0_i32_0 = arith.constant 0 : i32
    %c0_i32_1 = arith.constant 0 : i32
    return %c0_i32, %c0_i32_0 : i32, i32
  }
  func.func @transform_2(%arg0: i32, %arg1: i32) -> (i32, i32) {
    %c0_i32 = arith.constant 0 : i32
    %c0_i32_0 = arith.constant 0 : i32
    %c0_i32_1 = arith.constant 0 : i32
    return %c0_i32, %c0_i32_0 : i32, i32
  }
  func.func @transform_3(%arg0: i32, %arg1: i32) -> (i32, i32, i32) {
    %c0_i32 = arith.constant 0 : i32
    %c0_i32_0 = arith.constant 0 : i32
    return %arg0, %c0_i32, %arg1 : i32, i32, i32
  }
}

module attributes {stable_mosaic.version = 11 : i64} {
  func.func @_fused_double_conv_kernel(%arg0: i32, %arg1: memref<1x4x1024xf32, #tpu.memory_space<vmem>>, %arg2: memref<1x4x1024xf32, #tpu.memory_space<vmem>>, %arg3: memref<9x1024xf32, #tpu.memory_space<vmem>>, %arg4: memref<8x72xf32, #tpu.memory_space<vmem>>, %arg5: memref<8x1xf32, #tpu.memory_space<vmem>>, %arg6: memref<8x1xf32, #tpu.memory_space<vmem>>, %arg7: memref<8x72xf32, #tpu.memory_space<vmem>>, %arg8: memref<8x1xf32, #tpu.memory_space<vmem>>, %arg9: memref<8x1xf32, #tpu.memory_space<vmem>>, %arg10: memref<1x8x1024xf32, #tpu.memory_space<vmem>>, %arg11: memref<8x1090xf32, #tpu.memory_space<vmem>>, %arg12: memref<72x1024xf32, #tpu.memory_space<vmem>>) attributes {dimension_semantics = [#tpu.dimension_semantics<parallel>], iteration_bounds = array<i64: 2>, scalar_prefetch = 0 : i64, scratch_operands = 2 : i64, tpu.core_type = #tpu.core_type<tc>, window_params = [{transform_indices = @transform_0, window_bounds = array<i64: 1, 4, 1024>}, {transform_indices = @transform_1, window_bounds = array<i64: 1, 4, 1024>}, {pipeline_mode = #tpu.pipeline_mode<synchronous>, transform_indices = @transform_2, window_bounds = array<i64: 9, 1024>}, {pipeline_mode = #tpu.pipeline_mode<synchronous>, transform_indices = @transform_3, window_bounds = array<i64: 8, 72>}, {pipeline_mode = #tpu.pipeline_mode<synchronous>, transform_indices = @transform_4, window_bounds = array<i64: 8, 1>}, {pipeline_mode = #tpu.pipeline_mode<synchronous>, transform_indices = @transform_5, window_bounds = array<i64: 8, 1>}, {pipeline_mode = #tpu.pipeline_mode<synchronous>, transform_indices = @transform_6, window_bounds = array<i64: 8, 72>}, {pipeline_mode = #tpu.pipeline_mode<synchronous>, transform_indices = @transform_7, window_bounds = array<i64: 8, 1>}, {pipeline_mode = #tpu.pipeline_mode<synchronous>, transform_indices = @transform_8, window_bounds = array<i64: 8, 1>}, {transform_indices = @transform_9, window_bounds = array<i64: 1, 8, 1024>}]} {
    %c0 = arith.constant 0 : index
    %c0_0 = arith.constant 0 : index
    %0 = vector.load %arg3[%c0, %c0_0] : memref<9x1024xf32, #tpu.memory_space<vmem>>, vector<9x1024xf32>
    %cst = arith.constant 0.000000e+00 : f32
    %1 = vector.broadcast %cst : f32 to vector<8x33xf32>
    %c0_1 = arith.constant 0 : index
    %c0_2 = arith.constant 0 : index
    %2 = vector.load %arg11[%c0_1, %c0_2] : memref<8x1090xf32, #tpu.memory_space<vmem>>, vector<8x33xf32>
    tpu.vector_store %arg11[%c0_1, %c0_2], %1 {strides = array<i32>} : memref<8x1090xf32, #tpu.memory_space<vmem>>, vector<8x33xf32>,
    %c0_3 = arith.constant 0 : index
    %c1057 = arith.constant 1057 : index
    %3 = vector.load %arg11[%c0_3, %c1057] : memref<8x1090xf32, #tpu.memory_space<vmem>>, vector<8x33xf32>
    tpu.vector_store %arg11[%c0_3, %c1057], %1 {strides = array<i32>} : memref<8x1090xf32, #tpu.memory_space<vmem>>, vector<8x33xf32>,
    %c0_4 = arith.constant 0 : index
    %c0_5 = arith.constant 0 : index
    %c0_6 = arith.constant 0 : index
    %4 = vector.load %arg1[%c0_4, %c0_5, %c0_6] : memref<1x4x1024xf32, #tpu.memory_space<vmem>>, vector<1x4x1024xf32>
    %5 = vector.shape_cast %4 : vector<1x4x1024xf32> to vector<4x1024xf32>
    %c0_7 = arith.constant 0 : index
    %c33 = arith.constant 33 : index
    %6 = vector.load %arg11[%c0_7, %c33] : memref<8x1090xf32, #tpu.memory_space<vmem>>, vector<4x1024xf32>
    tpu.vector_store %arg11[%c0_7, %c33], %5 {strides = array<i32>} : memref<8x1090xf32, #tpu.memory_space<vmem>>, vector<4x1024xf32>,
    %c0_8 = arith.constant 0 : index
    %c0_9 = arith.constant 0 : index
    %c0_10 = arith.constant 0 : index
    %7 = vector.load %arg2[%c0_8, %c0_9, %c0_10] : memref<1x4x1024xf32, #tpu.memory_space<vmem>>, vector<1x4x1024xf32>
    %8 = vector.shape_cast %7 : vector<1x4x1024xf32> to vector<4x1024xf32>
    %c4 = arith.constant 4 : index
    %c33_11 = arith.constant 33 : index
    %9 = vector.load %arg11[%c4, %c33_11] : memref<8x1090xf32, #tpu.memory_space<vmem>>, vector<4x1024xf32>
    tpu.vector_store %arg11[%c4, %c33_11], %8 {strides = array<i32>} : memref<8x1090xf32, #tpu.memory_space<vmem>>, vector<4x1024xf32>,
    %c0_12 = arith.constant 0 : index
    %c0_13 = arith.constant 0 : index
    %10 = vector.load %arg11[%c0_12, %c0_13] : memref<8x1090xf32, #tpu.memory_space<vmem>>, vector<8x1024xf32>
    %11 = vector.extract_strided_slice %0 {offsets = [0, 0], sizes = [1, 1024], strides = [1, 1]} : vector<9x1024xf32> to vector<1x1024xf32>
    %12 = vector.broadcast %11 : vector<1x1024xf32> to vector<8x1024xf32>
    %13 = arith.mulf %10, %12 : vector<8x1024xf32>
    %c0_14 = arith.constant 0 : index
    %c0_15 = arith.constant 0 : index
    %14 = vector.load %arg12[%c0_14, %c0_15] : memref<72x1024xf32, #tpu.memory_space<vmem>>, vector<8x1024xf32>
    tpu.vector_store %arg12[%c0_14, %c0_15], %13 {strides = array<i32>} : memref<72x1024xf32, #tpu.memory_space<vmem>>, vector<8x1024xf32>,
    %c0_16 = arith.constant 0 : index
    %c1 = arith.constant 1 : index
    %15 = vector.load %arg11[%c0_16, %c1] : memref<8x1090xf32, #tpu.memory_space<vmem>>, vector<8x1024xf32>
    %16 = vector.extract_strided_slice %0 {offsets = [1, 0], sizes = [1, 1024], strides = [1, 1]} : vector<9x1024xf32> to vector<1x1024xf32>
    %17 = vector.broadcast %16 : vector<1x1024xf32> to vector<8x1024xf32>
    %18 = arith.mulf %15, %17 : vector<8x1024xf32>
    %c8 = arith.constant 8 : index
    %c0_17 = arith.constant 0 : index
    %19 = vector.load %arg12[%c8, %c0_17] : memref<72x1024xf32, #tpu.memory_space<vmem>>, vector<8x1024xf32>
    tpu.vector_store %arg12[%c8, %c0_17], %18 {strides = array<i32>} : memref<72x1024xf32, #tpu.memory_space<vmem>>, vector<8x1024xf32>,
    %c0_18 = arith.constant 0 : index
    %c2 = arith.constant 2 : index
    %20 = vector.load %arg11[%c0_18, %c2] : memref<8x1090xf32, #tpu.memory_space<vmem>>, vector<8x1024xf32>
    %21 = vector.extract_strided_slice %0 {offsets = [2, 0], sizes = [1, 1024], strides = [1, 1]} : vector<9x1024xf32> to vector<1x1024xf32>
    %22 = vector.broadcast %21 : vector<1x1024xf32> to vector<8x1024xf32>
    %23 = arith.mulf %20, %22 : vector<8x1024xf32>
    %c16 = arith.constant 16 : index
    %c0_19 = arith.constant 0 : index
    %24 = vector.load %arg12[%c16, %c0_19] : memref<72x1024xf32, #tpu.memory_space<vmem>>, vector<8x1024xf32>
    tpu.vector_store %arg12[%c16, %c0_19], %23 {strides = array<i32>} : memref<72x1024xf32, #tpu.memory_space<vmem>>, vector<8x1024xf32>,
    %c0_20 = arith.constant 0 : index
    %c32 = arith.constant 32 : index
    %25 = vector.load %arg11[%c0_20, %c32] : memref<8x1090xf32, #tpu.memory_space<vmem>>, vector<8x1024xf32>
    %26 = vector.extract_strided_slice %0 {offsets = [3, 0], sizes = [1, 1024], strides = [1, 1]} : vector<9x1024xf32> to vector<1x1024xf32>
    %27 = vector.broadcast %26 : vector<1x1024xf32> to vector<8x1024xf32>
    %28 = arith.mulf %25, %27 : vector<8x1024xf32>
    %c24 = arith.constant 24 : index
    %c0_21 = arith.constant 0 : index
    %29 = vector.load %arg12[%c24, %c0_21] : memref<72x1024xf32, #tpu.memory_space<vmem>>, vector<8x1024xf32>
    tpu.vector_store %arg12[%c24, %c0_21], %28 {strides = array<i32>} : memref<72x1024xf32, #tpu.memory_space<vmem>>, vector<8x1024xf32>,
    %c0_22 = arith.constant 0 : index
    %c33_23 = arith.constant 33 : index
    %30 = vector.load %arg11[%c0_22, %c33_23] : memref<8x1090xf32, #tpu.memory_space<vmem>>, vector<8x1024xf32>
    %31 = vector.extract_strided_slice %0 {offsets = [4, 0], sizes = [1, 1024], strides = [1, 1]} : vector<9x1024xf32> to vector<1x1024xf32>
    %32 = vector.broadcast %31 : vector<1x1024xf32> to vector<8x1024xf32>
    %33 = arith.mulf %30, %32 : vector<8x1024xf32>
    %c32_24 = arith.constant 32 : index
    %c0_25 = arith.constant 0 : index
    %34 = vector.load %arg12[%c32_24, %c0_25] : memref<72x1024xf32, #tpu.memory_space<vmem>>, vector<8x1024xf32>
    tpu.vector_store %arg12[%c32_24, %c0_25], %33 {strides = array<i32>} : memref<72x1024xf32, #tpu.memory_space<vmem>>, vector<8x1024xf32>,
    %c0_26 = arith.constant 0 : index
    %c34 = arith.constant 34 : index
    %35 = vector.load %arg11[%c0_26, %c34] : memref<8x1090xf32, #tpu.memory_space<vmem>>, vector<8x1024xf32>
    %36 = vector.extract_strided_slice %0 {offsets = [5, 0], sizes = [1, 1024], strides = [1, 1]} : vector<9x1024xf32> to vector<1x1024xf32>
    %37 = vector.broadcast %36 : vector<1x1024xf32> to vector<8x1024xf32>
    %38 = arith.mulf %35, %37 : vector<8x1024xf32>
    %c40 = arith.constant 40 : index
    %c0_27 = arith.constant 0 : index
    %39 = vector.load %arg12[%c40, %c0_27] : memref<72x1024xf32, #tpu.memory_space<vmem>>, vector<8x1024xf32>
    tpu.vector_store %arg12[%c40, %c0_27], %38 {strides = array<i32>} : memref<72x1024xf32, #tpu.memory_space<vmem>>, vector<8x1024xf32>,
    %c0_28 = arith.constant 0 : index
    %c64 = arith.constant 64 : index
    %40 = vector.load %arg11[%c0_28, %c64] : memref<8x1090xf32, #tpu.memory_space<vmem>>, vector<8x1024xf32>
    %41 = vector.extract_strided_slice %0 {offsets = [6, 0], sizes = [1, 1024], strides = [1, 1]} : vector<9x1024xf32> to vector<1x1024xf32>
    %42 = vector.broadcast %41 : vector<1x1024xf32> to vector<8x1024xf32>
    %43 = arith.mulf %40, %42 : vector<8x1024xf32>
    %c48 = arith.constant 48 : index
    %c0_29 = arith.constant 0 : index
    %44 = vector.load %arg12[%c48, %c0_29] : memref<72x1024xf32, #tpu.memory_space<vmem>>, vector<8x1024xf32>
    tpu.vector_store %arg12[%c48, %c0_29], %43 {strides = array<i32>} : memref<72x1024xf32, #tpu.memory_space<vmem>>, vector<8x1024xf32>,
    %c0_30 = arith.constant 0 : index
    %c65 = arith.constant 65 : index
    %45 = vector.load %arg11[%c0_30, %c65] : memref<8x1090xf32, #tpu.memory_space<vmem>>, vector<8x1024xf32>
    %46 = vector.extract_strided_slice %0 {offsets = [7, 0], sizes = [1, 1024], strides = [1, 1]} : vector<9x1024xf32> to vector<1x1024xf32>
    %47 = vector.broadcast %46 : vector<1x1024xf32> to vector<8x1024xf32>
    %48 = arith.mulf %45, %47 : vector<8x1024xf32>
    %c56 = arith.constant 56 : index
    %c0_31 = arith.constant 0 : index
    %49 = vector.load %arg12[%c56, %c0_31] : memref<72x1024xf32, #tpu.memory_space<vmem>>, vector<8x1024xf32>
    tpu.vector_store %arg12[%c56, %c0_31], %48 {strides = array<i32>} : memref<72x1024xf32, #tpu.memory_space<vmem>>, vector<8x1024xf32>,
    %c0_32 = arith.constant 0 : index
    %c66 = arith.constant 66 : index
    %50 = vector.load %arg11[%c0_32, %c66] : memref<8x1090xf32, #tpu.memory_space<vmem>>, vector<8x1024xf32>
    %51 = vector.extract_strided_slice %0 {offsets = [8, 0], sizes = [1, 1024], strides = [1, 1]} : vector<9x1024xf32> to vector<1x1024xf32>
    %52 = vector.broadcast %51 : vector<1x1024xf32> to vector<8x1024xf32>
    %53 = arith.mulf %50, %52 : vector<8x1024xf32>
    %c64_33 = arith.constant 64 : index
    %c0_34 = arith.constant 0 : index
    %54 = vector.load %arg12[%c64_33, %c0_34] : memref<72x1024xf32, #tpu.memory_space<vmem>>, vector<8x1024xf32>
    tpu.vector_store %arg12[%c64_33, %c0_34], %53 {strides = array<i32>} : memref<72x1024xf32, #tpu.memory_space<vmem>>, vector<8x1024xf32>,
    %c0_35 = arith.constant 0 : index
    %c0_36 = arith.constant 0 : index
    %55 = vector.load %arg4[%c0_35, %c0_36] : memref<8x72xf32, #tpu.memory_space<vmem>>, vector<8x72xf32>
    %c0_37 = arith.constant 0 : index
    %c0_38 = arith.constant 0 : index
    %56 = vector.load %arg12[%c0_37, %c0_38] : memref<72x1024xf32, #tpu.memory_space<vmem>>, vector<72x1024xf32>
    %cst_39 = arith.constant dense<0.000000e+00> : vector<8x1024xf32>
    %57 = tpu.matmul %55, %56, %cst_39 {dimension_numbers = #tpu.dot_dimension_numbers<[1], [0], [0], [1], [0, 0, 1, 1], [], []>} : vector<8x72xf32>, vector<72x1024xf32>, vector<8x1024xf32> -> vector<8x1024xf32>
    %c0_40 = arith.constant 0 : index
    %c0_41 = arith.constant 0 : index
    %58 = vector.load %arg5[%c0_40, %c0_41] : memref<8x1xf32, #tpu.memory_space<vmem>>, vector<8x1xf32>
    %59 = vector.broadcast %58 : vector<8x1xf32> to vector<8x1024xf32>
    %60 = arith.mulf %57, %59 : vector<8x1024xf32>
    %c0_42 = arith.constant 0 : index
    %c0_43 = arith.constant 0 : index
    %61 = vector.load %arg6[%c0_42, %c0_43] : memref<8x1xf32, #tpu.memory_space<vmem>>, vector<8x1xf32>
    %62 = vector.broadcast %61 : vector<8x1xf32> to vector<8x1024xf32>
    %63 = arith.addf %60, %62 : vector<8x1024xf32>
    %cst_44 = arith.constant 0.000000e+00 : f32
    %64 = vector.broadcast %cst_44 : f32 to vector<8x1024xf32>
    %65 = arith.maximumf %63, %64 : vector<8x1024xf32>
    %c0_45 = arith.constant 0 : index
    %c33_46 = arith.constant 33 : index
    %66 = vector.load %arg11[%c0_45, %c33_46] : memref<8x1090xf32, #tpu.memory_space<vmem>>, vector<8x1024xf32>
    tpu.vector_store %arg11[%c0_45, %c33_46], %65 {strides = array<i32>} : memref<8x1090xf32, #tpu.memory_space<vmem>>, vector<8x1024xf32>,
    %c0_47 = arith.constant 0 : index
    %c0_48 = arith.constant 0 : index
    %67 = vector.load %arg11[%c0_47, %c0_48] : memref<8x1090xf32, #tpu.memory_space<vmem>>, vector<8x1024xf32>
    %68 = vector.extract_strided_slice %0 {offsets = [0, 0], sizes = [1, 1024], strides = [1, 1]} : vector<9x1024xf32> to vector<1x1024xf32>
    %69 = vector.broadcast %68 : vector<1x1024xf32> to vector<8x1024xf32>
    %70 = arith.mulf %67, %69 : vector<8x1024xf32>
    %c0_49 = arith.constant 0 : index
    %c0_50 = arith.constant 0 : index
    %71 = vector.load %arg12[%c0_49, %c0_50] : memref<72x1024xf32, #tpu.memory_space<vmem>>, vector<8x1024xf32>
    tpu.vector_store %arg12[%c0_49, %c0_50], %70 {strides = array<i32>} : memref<72x1024xf32, #tpu.memory_space<vmem>>, vector<8x1024xf32>,
    %c0_51 = arith.constant 0 : index
    %c1_52 = arith.constant 1 : index
    %72 = vector.load %arg11[%c0_51, %c1_52] : memref<8x1090xf32, #tpu.memory_space<vmem>>, vector<8x1024xf32>
    %73 = vector.extract_strided_slice %0 {offsets = [1, 0], sizes = [1, 1024], strides = [1, 1]} : vector<9x1024xf32> to vector<1x1024xf32>
    %74 = vector.broadcast %73 : vector<1x1024xf32> to vector<8x1024xf32>
    %75 = arith.mulf %72, %74 : vector<8x1024xf32>
    %c8_53 = arith.constant 8 : index
    %c0_54 = arith.constant 0 : index
    %76 = vector.load %arg12[%c8_53, %c0_54] : memref<72x1024xf32, #tpu.memory_space<vmem>>, vector<8x1024xf32>
    tpu.vector_store %arg12[%c8_53, %c0_54], %75 {strides = array<i32>} : memref<72x1024xf32, #tpu.memory_space<vmem>>, vector<8x1024xf32>,
    %c0_55 = arith.constant 0 : index
    %c2_56 = arith.constant 2 : index
    %77 = vector.load %arg11[%c0_55, %c2_56] : memref<8x1090xf32, #tpu.memory_space<vmem>>, vector<8x1024xf32>
    %78 = vector.extract_strided_slice %0 {offsets = [2, 0], sizes = [1, 1024], strides = [1, 1]} : vector<9x1024xf32> to vector<1x1024xf32>
    %79 = vector.broadcast %78 : vector<1x1024xf32> to vector<8x1024xf32>
    %80 = arith.mulf %77, %79 : vector<8x1024xf32>
    %c16_57 = arith.constant 16 : index
    %c0_58 = arith.constant 0 : index
    %81 = vector.load %arg12[%c16_57, %c0_58] : memref<72x1024xf32, #tpu.memory_space<vmem>>, vector<8x1024xf32>
    tpu.vector_store %arg12[%c16_57, %c0_58], %80 {strides = array<i32>} : memref<72x1024xf32, #tpu.memory_space<vmem>>, vector<8x1024xf32>,
    %c0_59 = arith.constant 0 : index
    %c32_60 = arith.constant 32 : index
    %82 = vector.load %arg11[%c0_59, %c32_60] : memref<8x1090xf32, #tpu.memory_space<vmem>>, vector<8x1024xf32>
    %83 = vector.extract_strided_slice %0 {offsets = [3, 0], sizes = [1, 1024], strides = [1, 1]} : vector<9x1024xf32> to vector<1x1024xf32>
    %84 = vector.broadcast %83 : vector<1x1024xf32> to vector<8x1024xf32>
    %85 = arith.mulf %82, %84 : vector<8x1024xf32>
    %c24_61 = arith.constant 24 : index
    %c0_62 = arith.constant 0 : index
    %86 = vector.load %arg12[%c24_61, %c0_62] : memref<72x1024xf32, #tpu.memory_space<vmem>>, vector<8x1024xf32>
    tpu.vector_store %arg12[%c24_61, %c0_62], %85 {strides = array<i32>} : memref<72x1024xf32, #tpu.memory_space<vmem>>, vector<8x1024xf32>,
    %c0_63 = arith.constant 0 : index
    %c33_64 = arith.constant 33 : index
    %87 = vector.load %arg11[%c0_63, %c33_64] : memref<8x1090xf32, #tpu.memory_space<vmem>>, vector<8x1024xf32>
    %88 = vector.extract_strided_slice %0 {offsets = [4, 0], sizes = [1, 1024], strides = [1, 1]} : vector<9x1024xf32> to vector<1x1024xf32>
    %89 = vector.broadcast %88 : vector<1x1024xf32> to vector<8x1024xf32>
    %90 = arith.mulf %87, %89 : vector<8x1024xf32>
    %c32_65 = arith.constant 32 : index
    %c0_66 = arith.constant 0 : index
    %91 = vector.load %arg12[%c32_65, %c0_66] : memref<72x1024xf32, #tpu.memory_space<vmem>>, vector<8x1024xf32>
    tpu.vector_store %arg12[%c32_65, %c0_66], %90 {strides = array<i32>} : memref<72x1024xf32, #tpu.memory_space<vmem>>, vector<8x1024xf32>,
    %c0_67 = arith.constant 0 : index
    %c34_68 = arith.constant 34 : index
    %92 = vector.load %arg11[%c0_67, %c34_68] : memref<8x1090xf32, #tpu.memory_space<vmem>>, vector<8x1024xf32>
    %93 = vector.extract_strided_slice %0 {offsets = [5, 0], sizes = [1, 1024], strides = [1, 1]} : vector<9x1024xf32> to vector<1x1024xf32>
    %94 = vector.broadcast %93 : vector<1x1024xf32> to vector<8x1024xf32>
    %95 = arith.mulf %92, %94 : vector<8x1024xf32>
    %c40_69 = arith.constant 40 : index
    %c0_70 = arith.constant 0 : index
    %96 = vector.load %arg12[%c40_69, %c0_70] : memref<72x1024xf32, #tpu.memory_space<vmem>>, vector<8x1024xf32>
    tpu.vector_store %arg12[%c40_69, %c0_70], %95 {strides = array<i32>} : memref<72x1024xf32, #tpu.memory_space<vmem>>, vector<8x1024xf32>,
    %c0_71 = arith.constant 0 : index
    %c64_72 = arith.constant 64 : index
    %97 = vector.load %arg11[%c0_71, %c64_72] : memref<8x1090xf32, #tpu.memory_space<vmem>>, vector<8x1024xf32>
    %98 = vector.extract_strided_slice %0 {offsets = [6, 0], sizes = [1, 1024], strides = [1, 1]} : vector<9x1024xf32> to vector<1x1024xf32>
    %99 = vector.broadcast %98 : vector<1x1024xf32> to vector<8x1024xf32>
    %100 = arith.mulf %97, %99 : vector<8x1024xf32>
    %c48_73 = arith.constant 48 : index
    %c0_74 = arith.constant 0 : index
    %101 = vector.load %arg12[%c48_73, %c0_74] : memref<72x1024xf32, #tpu.memory_space<vmem>>, vector<8x1024xf32>
    tpu.vector_store %arg12[%c48_73, %c0_74], %100 {strides = array<i32>} : memref<72x1024xf32, #tpu.memory_space<vmem>>, vector<8x1024xf32>,
    %c0_75 = arith.constant 0 : index
    %c65_76 = arith.constant 65 : index
    %102 = vector.load %arg11[%c0_75, %c65_76] : memref<8x1090xf32, #tpu.memory_space<vmem>>, vector<8x1024xf32>
    %103 = vector.extract_strided_slice %0 {offsets = [7, 0], sizes = [1, 1024], strides = [1, 1]} : vector<9x1024xf32> to vector<1x1024xf32>
    %104 = vector.broadcast %103 : vector<1x1024xf32> to vector<8x1024xf32>
    %105 = arith.mulf %102, %104 : vector<8x1024xf32>
    %c56_77 = arith.constant 56 : index
    %c0_78 = arith.constant 0 : index
    %106 = vector.load %arg12[%c56_77, %c0_78] : memref<72x1024xf32, #tpu.memory_space<vmem>>, vector<8x1024xf32>
    tpu.vector_store %arg12[%c56_77, %c0_78], %105 {strides = array<i32>} : memref<72x1024xf32, #tpu.memory_space<vmem>>, vector<8x1024xf32>,
    %c0_79 = arith.constant 0 : index
    %c66_80 = arith.constant 66 : index
    %107 = vector.load %arg11[%c0_79, %c66_80] : memref<8x1090xf32, #tpu.memory_space<vmem>>, vector<8x1024xf32>
    %108 = vector.extract_strided_slice %0 {offsets = [8, 0], sizes = [1, 1024], strides = [1, 1]} : vector<9x1024xf32> to vector<1x1024xf32>
    %109 = vector.broadcast %108 : vector<1x1024xf32> to vector<8x1024xf32>
    %110 = arith.mulf %107, %109 : vector<8x1024xf32>
    %c64_81 = arith.constant 64 : index
    %c0_82 = arith.constant 0 : index
    %111 = vector.load %arg12[%c64_81, %c0_82] : memref<72x1024xf32, #tpu.memory_space<vmem>>, vector<8x1024xf32>
    tpu.vector_store %arg12[%c64_81, %c0_82], %110 {strides = array<i32>} : memref<72x1024xf32, #tpu.memory_space<vmem>>, vector<8x1024xf32>,
    %c0_83 = arith.constant 0 : index
    %c0_84 = arith.constant 0 : index
    %112 = vector.load %arg7[%c0_83, %c0_84] : memref<8x72xf32, #tpu.memory_space<vmem>>, vector<8x72xf32>
    %c0_85 = arith.constant 0 : index
    %c0_86 = arith.constant 0 : index
    %113 = vector.load %arg12[%c0_85, %c0_86] : memref<72x1024xf32, #tpu.memory_space<vmem>>, vector<72x1024xf32>
    %cst_87 = arith.constant dense<0.000000e+00> : vector<8x1024xf32>
    %114 = tpu.matmul %112, %113, %cst_87 {dimension_numbers = #tpu.dot_dimension_numbers<[1], [0], [0], [1], [0, 0, 1, 1], [], []>} : vector<8x72xf32>, vector<72x1024xf32>, vector<8x1024xf32> -> vector<8x1024xf32>
    %c0_88 = arith.constant 0 : index
    %c0_89 = arith.constant 0 : index
    %115 = vector.load %arg8[%c0_88, %c0_89] : memref<8x1xf32, #tpu.memory_space<vmem>>, vector<8x1xf32>
    %116 = vector.broadcast %115 : vector<8x1xf32> to vector<8x1024xf32>
    %117 = arith.mulf %114, %116 : vector<8x1024xf32>
    %c0_90 = arith.constant 0 : index
    %c0_91 = arith.constant 0 : index
    %118 = vector.load %arg9[%c0_90, %c0_91] : memref<8x1xf32, #tpu.memory_space<vmem>>, vector<8x1xf32>
    %119 = vector.broadcast %118 : vector<8x1xf32> to vector<8x1024xf32>
    %120 = arith.addf %117, %119 : vector<8x1024xf32>
    %cst_92 = arith.constant 0.000000e+00 : f32
    %121 = vector.broadcast %cst_92 : f32 to vector<8x1024xf32>
    %122 = arith.maximumf %120, %121 : vector<8x1024xf32>
    %c0_93 = arith.constant 0 : index
    %c0_94 = arith.constant 0 : index
    %c0_95 = arith.constant 0 : index
    %123 = vector.load %arg10[%c0_93, %c0_94, %c0_95] : memref<1x8x1024xf32, #tpu.memory_space<vmem>>, vector<1x8x1024xf32>
    %124 = vector.shape_cast %123 : vector<1x8x1024xf32> to vector<8x1024xf32>
    %125 = vector.shape_cast %122 : vector<8x1024xf32> to vector<1x8x1024xf32>
    tpu.vector_store %arg10[%c0_93, %c0_94, %c0_95], %125 {strides = array<i32>} : memref<1x8x1024xf32, #tpu.memory_space<vmem>>, vector<1x8x1024xf32>,
    return
  }
  func.func @transform_0(%arg0: i32) -> (i32, i32, i32) {
    %c0_i32 = arith.constant 0 : i32
    %c0_i32_0 = arith.constant 0 : i32
    %c0_i32_1 = arith.constant 0 : i32
    return %arg0, %c0_i32, %c0_i32_0 : i32, i32, i32
  }
  func.func @transform_1(%arg0: i32) -> (i32, i32, i32) {
    %c0_i32 = arith.constant 0 : i32
    %c0_i32_0 = arith.constant 0 : i32
    %c0_i32_1 = arith.constant 0 : i32
    return %arg0, %c0_i32, %c0_i32_0 : i32, i32, i32
  }
  func.func @transform_2(%arg0: i32) -> (i32, i32) {
    %c0_i32 = arith.constant 0 : i32
    %c0_i32_0 = arith.constant 0 : i32
    %c0_i32_1 = arith.constant 0 : i32
    return %c0_i32, %c0_i32_0 : i32, i32
  }
  func.func @transform_3(%arg0: i32) -> (i32, i32) {
    %c0_i32 = arith.constant 0 : i32
    %c0_i32_0 = arith.constant 0 : i32
    %c0_i32_1 = arith.constant 0 : i32
    return %c0_i32, %c0_i32_0 : i32, i32
  }
  func.func @transform_4(%arg0: i32) -> (i32, i32) {
    %c0_i32 = arith.constant 0 : i32
    %c0_i32_0 = arith.constant 0 : i32
    %c0_i32_1 = arith.constant 0 : i32
    return %c0_i32, %c0_i32_0 : i32, i32
  }
  func.func @transform_5(%arg0: i32) -> (i32, i32) {
    %c0_i32 = arith.constant 0 : i32
    %c0_i32_0 = arith.constant 0 : i32
    %c0_i32_1 = arith.constant 0 : i32
    return %c0_i32, %c0_i32_0 : i32, i32
  }
  func.func @transform_6(%arg0: i32) -> (i32, i32) {
    %c0_i32 = arith.constant 0 : i32
    %c0_i32_0 = arith.constant 0 : i32
    %c0_i32_1 = arith.constant 0 : i32
    return %c0_i32, %c0_i32_0 : i32, i32
  }
  func.func @transform_7(%arg0: i32) -> (i32, i32) {
    %c0_i32 = arith.constant 0 : i32
    %c0_i32_0 = arith.constant 0 : i32
    %c0_i32_1 = arith.constant 0 : i32
    return %c0_i32, %c0_i32_0 : i32, i32
  }
  func.func @transform_8(%arg0: i32) -> (i32, i32) {
    %c0_i32 = arith.constant 0 : i32
    %c0_i32_0 = arith.constant 0 : i32
    %c0_i32_1 = arith.constant 0 : i32
    return %c0_i32, %c0_i32_0 : i32, i32
  }
  func.func @transform_9(%arg0: i32) -> (i32, i32, i32) {
    %c0_i32 = arith.constant 0 : i32
    %c0_i32_0 = arith.constant 0 : i32
    %c0_i32_1 = arith.constant 0 : i32
    return %arg0, %c0_i32, %c0_i32_0 : i32, i32, i32
  }
}

</mosaic_0001>

<bundles_post_ra>
// kernel: decoder_block_forward.2
= control target key start
LH: loop header
LB: loop body
LE: loop exit
PB: predicated region body
PF: predicated region fallthrough
CT: control target
= control target key end

     0   :  { %s474_s12 = smov 0   ;;  %s476_s13 = smov 0   ;;  %s519_s0 = inlined_call_operand.vmem [shape: f32[2,4,256], index: 0, kind: input, shape index: {}]   ;;  %s520_s1 = inlined_call_operand.vmem [shape: f32[16,4], index: 1, kind: input, shape index: {}]   ;;  %s521_s2 = inlined_call_operand.vmem [shape: f32[16,1], index: 2, kind: input, shape index: {}]   ;;  %s522_s3 = inlined_call_operand.vmem [shape: f32[2,16,256], index: 3, kind: output, shape index: {}]  }
   0x1   :  { %s478_s14 = smov 0  }
   0x2 LB: > { %s25_s15 = sadd.s32 1, %s447_s13  ;;  %p386_p0 = scmp.ge.s32.totalorder %s451_s14, 1  ;;  %s451_s14 = sphi %s478_s14, %s13_s14   ;;  %s447_s13 = sphi %s476_s13, %s524_s13   ;;  %s443_s12 = sphi %s474_s12, %s523_s12  }
   0x3   : > { %p27_p1 = scmp.ge.s32.totalorder %s25_s15, 2  ;;  %p158_p2 = scmp.lt.s32.totalorder %s451_s14, 3 }
   0x5   : > { %s526_s15 = smov (%p27_p1, %s25_s15), 0  ;;  %p159_p3 = pnand %p386_p0, %p158_p2 }
   0x6   : > { %p191_p4 = scmp.lt.s32.totalorder (!%p159_p3), %s443_s12, 1 }
   0x7   : > { %162 = sbr.rel (%p159_p3) target bundleno = 164 (0xa4), region = 32 }
   0xc   : > { %v453_v0 = vmov 0   ;;  %v213_v1 = vld [vmem:[%s521_s2] sm:$0xff]  ;;  %s528_s12 = smov (!%p191_p4, %s443_s12), 1  ;;  %v214_v3 = vld [vmem:[%s521_s2 + $0x8] sm:$0xff]  ;;  %vm236_vm0 = vcmask 1043456   ;;  %vm229_vm1 = vcmask 31744  }
   0xd   : > { %428 = vset.pattern.permute.xlu0 %v453_v0  ;;  %s399_s18 = sshll.u32 %s528_s12, 3  ;;  %v211_v4 = vld [vmem:[%s520_s1] sm:$0xff]  ;;  %v212_v5 = vld [vmem:[%s520_s1 + $0x8] sm:$0xff]  ;;  %s400_s28 = sshll.u32 %s528_s12, 5 }
   0xe   : > { %217 = vperm.xlu0 %428, %v213_v1   ;;  %s198_s21 = scalar_lea.vmem %s519_s0, %s399_s18  ;;  %s208_s4 = scalar_lea.vmem %s522_s3, %s400_s28 }
   0xf   : > { %v210_v2 = vld [vmem:[%s198_s21] sm:$0xff] }
  0x10   : > { %226 = vst [vmem:[#allocation1] ss:$2 sm:$0xff] %v210_v2 }
  0x16   : > { %222 = vperm.xlu0 %428, %v214_v3  }
  0x17   : > { %v227_v6 = vld.sshfl [vmem:[#allocation1] sm:$0xff pattern:$0x75316420]  ;;  %v228_v7 = vld.sshfl [vmem:[#allocation1 + $0x8] sm:$0xff pattern:$0x75316420] }
  0x18   : > { %391 = vmatpush.msk.msra.mxu0 %vm236_vm0, %v227_v6  ;;  %401 = vmatpush.msk.msra.mxu2 %vm236_vm0, %v227_v6 }
  0x19   : > { %394 = vmatpush.msk.msra.mxu1 %vm236_vm0, %v228_v7  ;;  %402 = vmatpush.msk.msra.mxu3 %vm236_vm0, %v228_v7 }
  0x1a   : > { %392 = vmatmul.msk.f32.vlgmr.msra.gmra.mxu0 %vm229_vm1, %v211_v4  ;;  %393 = vmatmul.msk.f32.vlgmr.msra.gmra.mxu2 %vm229_vm1, %v212_v5 }
  0x1b   : > { %395 = vmatmul.msk.f32.vlgmr.msra.gmra.mxu1 %vm229_vm1, %v211_v4  ;;  %396 = vmatmul.msk.f32.vlgmr.msra.gmra.mxu3 %vm229_vm1, %v212_v5 }
  0x80   : > { %v218_v8 = vpop.permute.xlu0 %217 }
  0x88   : > { %v223_v15 = vpop.permute.xlu0 %222 }
  0x97   : > { %v258_v9 = vpop.f32.mrf.mxu0 }
  0x98   : > { %v259_v10 = vadd.f32 %v258_v9, %v218_v8  ;;  %v281_v11 = vpop.f32.mrf.mxu1 }
  0x99   : > { %v282_v12 = vadd.f32 %v281_v11, %v218_v8 }
  0x9a   : > { %v287_v13 = vmax.f32 %v259_v10, 0.0 }
  0x9b   : > { %v288_v14 = vmax.f32 %v282_v12, 0.0 }
  0x9c   : > { %291 = vst [vmem:[%s208_s4] sm:$0xff] %v287_v13 }
  0x9d   : > { %292 = vst [vmem:[%s208_s4 + $0x8] sm:$0xff] %v288_v14  ;;  %v261_v16 = vpop.f32.mrf.mxu2 }
  0x9e   : > { %v262_v17 = vadd.f32 %v261_v16, %v223_v15  ;;  %v284_v18 = vpop.f32.mrf.mxu3 }
  0x9f   : > { %v285_v19 = vadd.f32 %v284_v18, %v223_v15 }
  0xa0   : > { %v289_v20 = vmax.f32 %v262_v17, 0.0 }
  0xa1   : > { %v290_v21 = vmax.f32 %v285_v19, 0.0 }
  0xa2   : > { %293 = vst [vmem:[%s208_s4 + $0x10] sm:$0xff] %v289_v20 }
  0xa3   : > { %294 = vst [vmem:[%s208_s4 + $0x18] sm:$0xff] %v290_v21 }
  0xa4 PF: > { %s13_s14 = sadd.s32 1, %s451_s14   ;;  %s523_s12 = smov %s447_s13 }
  0xa5   : > { %p10_p5 = scmp.ge.s32.totalorder %s13_s14, 4   ;;  %s524_s13 = smov %s526_s15 }
  0xa7   :  { %12 = sbr.rel (!%p10_p5) target bundleno = 2 (0x2), region = 62 }

// kernel: decoder_block_forward.3
= control target key start
LH: loop header
LB: loop body
LE: loop exit
PB: predicated region body
PF: predicated region fallthrough
CT: control target
= control target key end

     0   :  { %s3204_s30 = smov 0   ;;  %s4872_s0 = inlined_call_operand.vmem [shape: f32[2,4,1024], index: 0, kind: input, shape index: {}]   ;;  %s4873_s1 = inlined_call_operand.vmem [shape: f32[2,4,1024], index: 1, kind: input, shape index: {}]   ;;  %s4874_s2 = inlined_call_operand.vmem [shape: f32[9,1024], index: 2, kind: input, shape index: {}]   ;;  %s4875_s3 = inlined_call_operand.vmem [shape: f32[8,72], index: 3, kind: input, shape index: {}]   ;;  %s4876_s4 = inlined_call_operand.vmem [shape: f32[8,1], index: 4, kind: input, shape index: {}]   ;;  %s4877_s5 = inlined_call_operand.vmem [shape: f32[8,1], index: 5, kind: input, shape index: {}]   ;;  %s4878_s6 = inlined_call_operand.vmem [shape: f32[8,72], index: 6, kind: input, shape index: {}]   ;;  %s4879_s7 = inlined_call_operand.vmem [shape: f32[8,1], index: 7, kind: input, shape index: {}]   ;;  %s4880_s8 = inlined_call_operand.vmem [shape: f32[8,1], index: 8, kind: input, shape index: {}]   ;;  %s4881_s9 = inlined_call_operand.vmem [shape: f32[2,8,1024], index: 9, kind: output, shape index: {}]  }
   0x1 LB: > { %s2734_s10 = sadd.s32 4294967295, %s3135_s30   ;;  %p2738_p0 = scmp.ge.s32.totalorder %s3135_s30, 1  ;;  %s3135_s30 = sphi %s3204_s30, %s19_s30  }
   0x2   : > { %p297_p1 = scmp.lt.s32.totalorder %s3135_s30, 3 }
   0x4   : > { %p298_p2 = pnand %p2738_p0, %p297_p1 }
   0x6   : > { %301 = sbr.rel (%p298_p2) target bundleno = 1239 (0x4d7), region = 56 }
   0xb   : > { %p338_p3 = scmp.lt.s32.totalorder %s2734_s10, 1  ;;  %s3137_s18 = smov 33   ;;  %v3238_v23 = vld [vmem:[%s4874_s2 + $0x8] sm:$0xff]  ;;  %v3244_v24 = vld [vmem:[%s4874_s2] sm:$0xff]  ;;  %v3257_v29 = vld [vmem:[%s4874_s2 + $0x18] sm:$0xff]  ;;  %vm369_vm0 = vcmask 269312  }
   0xc   : > { %v548_v25 = vperm.slane %v3238_v23, 1  ;;  %v547_v26 = vperm.slane %v3244_v24, 1  ;;  %s3138_s23 = smov 1   ;;  %v3251_v28 = vld [vmem:[%s4874_s2 + $0x20] sm:$0xff]  ;;  %v3262_v30 = vld [vmem:[%s4874_s2 + $0x10] sm:$0xff]  ;;  %v550_v32 = vperm.slane %v3257_v29, 1 }
   0xd   : > { %s5125_s10 = smov (!%p338_p3, %s2734_s10), 1  ;;  %v551_v31 = vperm.slane %v3251_v28, 1  ;;  %v549_v33 = vperm.slane %v3262_v30, 1  ;;  %v3270_v34 = vld [vmem:[%s4874_s2 + $0x38] sm:$0xff]  ;;  %v3275_v35 = vld [vmem:[%s4874_s2 + $0x30] sm:$0xff]  ;;  %v3280_v36 = vld [vmem:[%s4874_s2 + $0x28] sm:$0xff] }
   0xe   : > { %s2763_s11 = sshll.u32 %s5125_s10, 5  ;;  %v554_v37 = vperm.slane %v3270_v34, 1  ;;  %v553_v38 = vperm.slane %v3275_v35, 1  ;;  %v552_v39 = vperm.slane %v3280_v36, 1  ;;  %v666_v40 = vperm.slane %v3244_v24, 2  ;;  %s3141_s19 = smov 32  }
   0xf   : > { %s342_s14 = scalar_lea.vmem %s4872_s0, %s2763_s11  ;;  %s347_s17 = scalar_lea.vmem %s4873_s1, %s2763_s11  ;;  %v668_v41 = vperm.slane %v3262_v30, 2  ;;  %v667_v42 = vperm.slane %v3238_v23, 2  ;;  %v669_v43 = vperm.slane %v3257_v29, 2  ;;  %v671_v44 = vperm.slane %v3280_v36, 2 }
  0x10   : > { %v375_v0 = vld [vmem:[%s342_s14 + $0x10] sm:$0xff]  ;;  %v374_v1 = vld [vmem:[%s342_s14 + $0x8] sm:$0xff]  ;;  %v373_v2 = vld [vmem:[%s342_s14] sm:$0xff]  ;;  %v670_v45 = vperm.slane %v3251_v28, 2  ;;  %v3140_v46 = vmov 0.0   ;;  %v672_v47 = vperm.slane %v3275_v35, 2 }
  0x11   : > { %385 = vst [vmem:[#allocation1 + $0x20] ss:$2 sm:$0xff] %v375_v0  ;;  %v376_v3 = vld [vmem:[%s342_s14 + $0x18] sm:$0xff]  ;;  %v441_v4 = vld [vmem:[%s347_s17 + $0x10] sm:$0xff]  ;;  %v440_v5 = vld [vmem:[%s347_s17 + $0x8] sm:$0xff]  ;;  %v786_v48 = vperm.slane %v3238_v23, 3 }
  0x12   : > { %383 = vst [vmem:[#allocation1 + $0x10] ss:$2 sm:$0xff] %v374_v1  ;;  %v439_v9 = vld [vmem:[%s347_s17] sm:$0xff]  ;;  %v442_v13 = vld [vmem:[%s347_s17 + $0x18] sm:$0xff]  ;;  %s3139_s17 = smov 2   ;;  %v673_v49 = vperm.slane %v3270_v34, 2 }
  0x13   : > { %381 = vst [vmem:[#allocation1] ss:$2 sm:$0xff] %v373_v2  ;;  %v787_v50 = vperm.slane %v3262_v30, 3  ;;  %v789_v51 = vperm.slane %v3251_v28, 3  ;;  %v785_v52 = vperm.slane %v3244_v24, 3  ;;  %v790_v54 = vperm.slane %v3280_v36, 3 }
  0x14   : > { %387 = vst [vmem:[#allocation1 + $0x30] ss:$2 sm:$0xff] %v376_v3  ;;  %v792_v55 = vperm.slane %v3270_v34, 3  ;;  %v788_v56 = vperm.slane %v3257_v29, 3  ;;  %vm371_vm1 = vcmask 539912   ;;  %v905_v59 = vperm.slane %v3238_v23, 4 }
  0x15   : > { %370 = vst.msk [vmem:[#allocation2] sm:$0xff] %vm369_vm0, %v3140_v46  ;;  %v904_v60 = vperm.slane %v3244_v24, 4  ;;  %v791_v61 = vperm.slane %v3275_v35, 3  ;;  %vm495_vm2 = vcmask 1047820   ;;  %vm428_vm3 = vcmask 1043720   ;;  %s3142_s20 = smov 127  }
  0x16   : > { %372 = vst.msk [vmem:[#allocation2 + $0x40] sm:$0xff] %vm371_vm1, %v3140_v46  ;;  %vm437_vm4 = vcmask 265216   ;;  %vm504_vm5 = vcmask 269316   ;;  %vm579_vm6 = vcmask 7168   ;;  %vm698_vm7 = vcmask 15360   ;;  %s3143_s21 = smov 126  }
  0x17   : > { %vm817_vm8 = vcmask 261120   ;;  %s3144_s22 = smov 96   ;;  %s3145_s25 = smov 66   ;;  %vm632_vm9 = vcmask 1039360   ;;  %vm751_vm10 = vcmask 1031168   ;;  %vm870_vm11 = vcmask 785408  }
  0x18   : > { %v392_v6 = vld.sshfl [vmem:[#allocation1 + $0x20] sm:$0xff pattern:$0x75316420]  ;;  %v393_v7 = vld.sshfl [vmem:[#allocation1 + $0x28] sm:$0xff pattern:$0x75316420] }
  0x19   : > { %404 = vrot.lane.b32.xlu2 %v392_v6, %s3137_s18  ;;  %v390_v8 = vld.sshfl [vmem:[#allocation1 + $0x10] sm:$0xff pattern:$0x75316420]  ;;  %452 = vst [vmem:[#allocation1 + $0x21] ss:$2 sm:$0xff] %v441_v4  ;;  %s3146_s26 = smov 65  }
  0x1a   : > { %400 = vrot.lane.b32.xlu1 %v390_v8, %s3137_s18  ;;  %v388_v10 = vld.sshfl [vmem:[#allocation1] sm:$0xff pattern:$0x75316420]  ;;  %v391_v11 = vld.sshfl [vmem:[#allocation1 + $0x18] sm:$0xff pattern:$0x75316420] }
  0x1b   : > { %396 = vrot.lane.b32.xlu0 %v388_v10, %s3137_s18  ;;  %450 = vst [vmem:[#allocation1 + $0x11] ss:$2 sm:$0xff] %v440_v5  ;;  %v389_v12 = vld.sshfl [vmem:[#allocation1 + $0x8] sm:$0xff pattern:$0x75316420]  ;;  %s3147_s14 = smov 95  }
  0x1c   : > { %448 = vst [vmem:[#allocation1 + $0x1] ss:$2 sm:$0xff] %v439_v9  ;;  %v395_v14 = vld.sshfl [vmem:[#allocation1 + $0x38] sm:$0xff pattern:$0x75316420]  ;;  %s3148_s15 = smov 64  }
  0x1d   : > { %v394_v15 = vld.sshfl [vmem:[#allocation1 + $0x30] sm:$0xff pattern:$0x75316420]  ;;  %s3149_s16 = smov 34   ;;  %vm1410_vm12 = vcmask 539648   ;;  %vm1291_vm13 = vcmask 531456  }
  0x1e   : > { %454 = vst [vmem:[#allocation1 + $0x31] ss:$2 sm:$0xff] %v442_v13  ;;  %vm1173_vm14 = vcmask 523264   ;;  %vm1054_vm15 = vcmask 277504   ;;  %s3152_s12 = smov 94   ;;  %vm1463_vm1 = vcmask 506880  }
  0x20   : > { %v460_v21 = vld.sshfl [vmem:[#allocation1 + $0x28] sm:$0xff pattern:$0x75316420]  ;;  %v459_v22 = vld.sshfl [vmem:[#allocation1 + $0x20] sm:$0xff pattern:$0x75316420] }
  0x21   : > { %406 = vrot.lane.b32.xlu2 %v393_v7, %s3137_s18 }
  0x22   : > { %402 = vrot.lane.b32.xlu1 %v391_v11, %s3137_s18  ;;  %v458_v17 = vld.sshfl [vmem:[#allocation1 + $0x18] sm:$0xff pattern:$0x75316420]  ;;  %v457_v18 = vld.sshfl [vmem:[#allocation1 + $0x10] sm:$0xff pattern:$0x75316420] }
  0x23   : > { %398 = vrot.lane.b32.xlu0 %v389_v12, %s3137_s18  ;;  %v455_v16 = vld.sshfl [vmem:[#allocation1] sm:$0xff pattern:$0x75316420]  ;;  %v456_v19 = vld.sshfl [vmem:[#allocation1 + $0x8] sm:$0xff pattern:$0x75316420] }
  0x25   : > { %v461_v20 = vld.sshfl [vmem:[#allocation1 + $0x30] sm:$0xff pattern:$0x75316420]  ;;  %v462_v27 = vld.sshfl [vmem:[#allocation1 + $0x38] sm:$0xff pattern:$0x75316420] }
  0x29   : > { %463 = vrot.lane.b32.xlu2 %v455_v16, %s3137_s18 }
  0x2a   : > { %410 = vrot.lane.b32.xlu1 %v395_v14, %s3137_s18 }
  0x2b   : > { %408 = vrot.lane.b32.xlu0 %v394_v15, %s3137_s18 }
  0x31   : > { %469 = vrot.lane.b32.xlu2 %v458_v17, %s3137_s18 }
  0x32   : > { %467 = vrot.lane.b32.xlu1 %v457_v18, %s3137_s18 }
  0x33   : > { %465 = vrot.lane.b32.xlu0 %v456_v19, %s3137_s18 }
  0x39   : > { %475 = vrot.lane.b32.xlu2 %v461_v20, %s3137_s18 }
  0x3a   : > { %473 = vrot.lane.b32.xlu1 %v460_v21, %s3137_s18 }
  0x3b   : > { %471 = vrot.lane.b32.xlu0 %v459_v22, %s3137_s18 }
  0x41   : > { %565 = vrot.lane.b32.xlu2 %v548_v25, %s3138_s23 }
  0x42   : > { %563 = vrot.lane.b32.xlu1 %v547_v26, %s3138_s23 }
  0x43   : > { %477 = vrot.lane.b32.xlu0 %v462_v27, %s3137_s18 }
  0x49   : > { %571 = vrot.lane.b32.xlu2 %v551_v31, %s3138_s23 }
  0x4a   : > { %569 = vrot.lane.b32.xlu1 %v550_v32, %s3138_s23 }
  0x4b   : > { %567 = vrot.lane.b32.xlu0 %v549_v33, %s3138_s23 }
  0x51   : > { %577 = vrot.lane.b32.xlu2 %v554_v37, %s3138_s23 }
  0x52   : > { %575 = vrot.lane.b32.xlu1 %v553_v38, %s3138_s23 }
  0x53   : > { %573 = vrot.lane.b32.xlu0 %v552_v39, %s3138_s23 }
  0x59   : > { %682 = vrot.lane.b32.xlu2 %v666_v40, %s3139_s17 }
  0x5a   : > { %686 = vrot.lane.b32.xlu1 %v668_v41, %s3139_s17 }
  0x5b   : > { %684 = vrot.lane.b32.xlu0 %v667_v42, %s3139_s17 }
  0x61   : > { %688 = vrot.lane.b32.xlu2 %v669_v43, %s3139_s17 }
  0x62   : > { %692 = vrot.lane.b32.xlu1 %v671_v44, %s3139_s17 }
  0x63   : > { %690 = vrot.lane.b32.xlu0 %v670_v45, %s3139_s17 }
  0x69   : > { %694 = vrot.lane.b32.xlu2 %v672_v47, %s3139_s17 }
  0x6a   : > { %803 = vrot.lane.b32.xlu1 %v786_v48, %s3141_s19 }
  0x6b   : > { %696 = vrot.lane.b32.xlu0 %v673_v49, %s3139_s17 }
  0x71   : > { %805 = vrot.lane.b32.xlu2 %v787_v50, %s3141_s19 }
  0x72   : > { %809 = vrot.lane.b32.xlu1 %v789_v51, %s3141_s19 }
  0x73   : > { %801 = vrot.lane.b32.xlu0 %v785_v52, %s3141_s19  ;;  %v405_v53 = vpop.permute.xlu2 %404 }
  0x79   : > { %811 = vrot.lane.b32.xlu2 %v790_v54, %s3141_s19 }
  0x7a   : > { %815 = vrot.lane.b32.xlu1 %v792_v55, %s3141_s19 }
  0x7b   : > { %807 = vrot.lane.b32.xlu0 %v788_v56, %s3141_s19  ;;  %v407_v57 = vpop.permute.xlu2 %406 }
  0x7c   : > { %v416_v58 = vsel %vm369_vm0, %v405_v53, %v407_v57 }
  0x7d   : > { %434 = vst [vmem:[#allocation2 + $0x28] sm:$0xf] %v416_v58 }
  0x81   : > { %922 = vrot.lane.b32.xlu2 %v905_v59, %s3137_s18 }
  0x82   : > { %920 = vrot.lane.b32.xlu1 %v904_v60, %s3137_s18 }
  0x83   : > { %813 = vrot.lane.b32.xlu0 %v791_v61, %s3141_s19  ;;  %v464_v62 = vpop.permute.xlu2 %463 }
  0x84   : > { %496 = vst.msk [vmem:[#allocation2] sm:$0xf0] %vm495_vm2, %v464_v62  ;;  %vm1344_vm2 = vcmask 515072  }
  0x8b   : > { %v470_v1 = vpop.permute.xlu2 %469 }
  0x8c   : > { %v401_v63 = vpop.permute.xlu1 %400 }
  0x8d   : > { %v397_v0 = vpop.permute.xlu0 %396 }
  0x8e   : > { %429 = vst.msk [vmem:[#allocation2] sm:$0xf] %vm428_vm3, %v397_v0  ;;  %vm1107_vm3 = vcmask 769024  }
  0x93   : > { %v476_v8 = vpop.permute.xlu2 %475 }
  0x94   : > { %v403_v2 = vpop.permute.xlu1 %402 }
  0x95   : > { %v414_v3 = vsel %vm369_vm0, %v401_v63, %v403_v2  ;;  %v415_v4 = vsel %vm369_vm0, %v403_v2, %v405_v53  ;;  %v399_v5 = vpop.permute.xlu0 %398  ;;  %v3355_v54 = vld [vmem:[#allocation2] sm:$0xff] }
  0x96   : > { %432 = vst [vmem:[#allocation2 + $0x18] sm:$0xf] %v414_v3  ;;  %v412_v6 = vsel %vm369_vm0, %v397_v0, %v399_v5  ;;  %v413_v7 = vsel %vm369_vm0, %v399_v5, %v401_v63 }
  0x97   : > { %433 = vst [vmem:[#allocation2 + $0x20] sm:$0xf] %v415_v4 }
  0x98   : > { %430 = vst [vmem:[#allocation2 + $0x8] sm:$0xf] %v412_v6 }
  0x99   : > { %431 = vst [vmem:[#allocation2 + $0x10] sm:$0xf] %v413_v7 }
  0x9b   : > { %v3313_v14 = vpop.permute.xlu2 %565 }
  0x9c   : > { %v411_v9 = vpop.permute.xlu1 %410 }
  0x9d   : > { %438 = vst.msk [vmem:[#allocation2 + $0x40] sm:$0xf] %vm437_vm4, %v411_v9  ;;  %v409_v10 = vpop.permute.xlu0 %408  ;;  %vm988_vm4 = vcmask 777216  }
  0x9e   : > { %v417_v11 = vsel %vm369_vm0, %v407_v57, %v409_v10  ;;  %v418_v12 = vsel %vm369_vm0, %v409_v10, %v411_v9 }
  0x9f   : > { %435 = vst [vmem:[#allocation2 + $0x30] sm:$0xf] %v417_v11 }
  0xa0   : > { %436 = vst [vmem:[#allocation2 + $0x38] sm:$0xf] %v418_v12 }
  0xa3   : > { %v572_v26 = vpop.permute.xlu2 %571 }
  0xa4   : > { %v468_v13 = vpop.permute.xlu1 %467 }
  0xa5   : > { %v481_v15 = vsel %vm369_vm0, %v468_v13, %v470_v1  ;;  %v466_v16 = vpop.permute.xlu0 %465 }
  0xa6   : > { %499 = vst [vmem:[#allocation2 + $0x18] sm:$0xf0] %v481_v15  ;;  %v479_v17 = vsel %vm369_vm0, %v464_v62, %v466_v16  ;;  %v480_v18 = vsel %vm369_vm0, %v466_v16, %v468_v13 }
  0xa7   : > { %497 = vst [vmem:[#allocation2 + $0x8] sm:$0xf0] %v479_v17 }
  0xa8   : > { %498 = vst [vmem:[#allocation2 + $0x10] sm:$0xf0] %v480_v18 }
  0xab   : > { %v3324_v33 = vpop.permute.xlu2 %577 }
  0xac   : > { %v474_v19 = vpop.permute.xlu1 %473  ;;  %4976 = vst [vmem:[#allocation5_spill] sm:$0xff] %v3324_v33 }
  0xad   : > { %v484_v20 = vsel %vm369_vm0, %v474_v19, %v476_v8  ;;  %v472_v21 = vpop.permute.xlu0 %471  ;;  %v3340_v44 = vld [vmem:[#allocation2 + $0x18] sm:$0xff] }
  0xae   : > { %502 = vst [vmem:[#allocation2 + $0x30] sm:$0xf0] %v484_v20  ;;  %v482_v22 = vsel %vm369_vm0, %v470_v1, %v472_v21  ;;  %v483_v25 = vsel %vm369_vm0, %v472_v21, %v474_v19  ;;  %v3357_v55 = vld [vmem:[#allocation2 + $0x8] sm:$0xff] }
  0xaf   : > { %500 = vst [vmem:[#allocation2 + $0x20] sm:$0xf0] %v482_v22  ;;  %v3338_v43 = vld [vmem:[#allocation2 + $0x10] sm:$0xff] }
  0xb0   : > { %501 = vst [vmem:[#allocation2 + $0x28] sm:$0xf0] %v483_v25 }
  0xb3   : > { %v3346_v47 = vpop.permute.xlu2 %682 }
  0xb4   : > { %v3321_v27 = vpop.permute.xlu1 %563  ;;  %4979 = vst [vmem:[#allocation8_spill] sm:$0xff] %v3346_v47  ;;  %v715_v57 = vmul.f32 %v3346_v47, %v3355_v54 }
  0xb5   : > { %4975 = vst [vmem:[#allocation4_spill] sm:$0xff] %v3321_v27  ;;  %v478_v31 = vpop.permute.xlu0 %477  ;;  %v3382_v3 = vld [vmem:[#allocation2 + $0x30] sm:$0xff] }
  0xb6   : > { %v485_v32 = vsel %vm369_vm0, %v476_v8, %v478_v31  ;;  %505 = vst.msk [vmem:[#allocation2 + $0x40] sm:$0xf0] %vm504_vm5, %v478_v31  ;;  %v3408_v15 = vld [vmem:[#allocation2 + $0x20] sm:$0xff]  ;;  %vm1561_vm5 = vcmask 588800  }
  0xb7   : > { %503 = vst [vmem:[#allocation2 + $0x38] sm:$0xf0] %v485_v32  ;;  %v3404_v11 = vld [vmem:[#allocation2 + $0x28] sm:$0xff] }
  0xbb   : > { %v3353_v51 = vpop.permute.xlu2 %688 }
  0xbc   : > { %v570_v37 = vpop.permute.xlu1 %569 }
  0xbd   : > { %v568_v38 = vpop.permute.xlu0 %567  ;;  %v3326_v39 = vld [vmem:[#allocation2 + $0x40] sm:$0xff]  ;;  %v3402_v10 = vsel %vm579_vm6, %v570_v37, %v572_v26 }
  0xbe   : > { %v604_v40 = vmul.f32 %v3324_v33, %v3326_v39  ;;  %v3332_v41 = vsel %vm579_vm6, %v3313_v14, %v568_v38  ;;  %v3335_v42 = vsel %vm579_vm6, %v568_v38, %v570_v37  ;;  %v3380_v2 = vld [vmem:[#allocation2 + $0x38] sm:$0xff]  ;;  %4985 = vst [vmem:[#allocation14_spill] sm:$0xff] %v3402_v10  ;;  %v600_v16 = vmul.f32 %v3402_v10, %v3408_v15 }
  0xbf   : > { %4977 = vst [vmem:[#allocation6_spill] sm:$0xff] %v3332_v41  ;;  %v598_v45 = vmul.f32 %v3332_v41, %v3338_v43  ;;  %v599_v46 = vmul.f32 %v3335_v42, %v3340_v44 }
  0xc0   : > { %4978 = vst [vmem:[#allocation7_spill] sm:$0xff] %v3335_v42  ;;  %630 = vrot.lane.b32.xlu1 %v604_v40, %s3142_s20  ;;  %v3437_v40 = vsel %vm579_vm6, %v3321_v27, %v3313_v14  ;;  %v596_v14 = vmul.f32 %v3321_v27, %v3355_v54 }
  0xc1   : > { %v2796_v50 = vpack.i.bf16 %v599_v46, %v598_v45  ;;  %4991 = vst [vmem:[#allocation20_spill] sm:$0xff] %v3437_v40 }
  0xc3   : > { %v695_v62 = vpop.permute.xlu2 %694 }
  0xc4   : > { %v3348_v48 = vpop.permute.xlu1 %575 }
  0xc5   : > { %v3350_v49 = vpop.permute.xlu0 %573 }
  0xc6   : > { %v3392_v6 = vsel %vm579_vm6, %v572_v26, %v3350_v49 }
  0xc7   : > { %4984 = vst [vmem:[#allocation13_spill] sm:$0xff] %v3392_v6  ;;  %v601_v13 = vmul.f32 %v3392_v6, %v3404_v11 }
  0xc8   : > { %2797 = vrot.lane.b32.xlu1 %v2796_v50, %s3142_s20 }
  0xc9   : > { %v2801_v19 = vpack.i.bf16 %v601_v13, %v600_v16 }
  0xcb   : > { %v3398_v9 = vpop.permute.xlu2 %805 }
  0xcc   : > { %v687_v52 = vpop.permute.xlu1 %686 }
  0xcd   : > { %v685_v53 = vpop.permute.xlu0 %684  ;;  %v3420_v21 = vsel %vm698_vm7, %v687_v52, %v3353_v51 }
  0xce   : > { %v3361_v56 = vsel %vm698_vm7, %v3346_v47, %v685_v53  ;;  %v3416_v20 = vsel %vm698_vm7, %v685_v53, %v687_v52  ;;  %4988 = vst [vmem:[#allocation17_spill] sm:$0xff] %v3420_v21  ;;  %v718_v26 = vmul.f32 %v3420_v21, %v3340_v44 }
  0xcf   : > { %4980 = vst [vmem:[#allocation9_spill] sm:$0xff] %v3361_v56  ;;  %v716_v58 = vmul.f32 %v3361_v56, %v3357_v55  ;;  %v717_v25 = vmul.f32 %v3416_v20, %v3338_v43 }
  0xd0   : > { %4987 = vst [vmem:[#allocation16_spill] sm:$0xff] %v3416_v20 }
  0xd1   : > { %v2811_v59 = vpack.i.bf16 %v716_v58, %v715_v57  ;;  %v2816_v46 = vpack.i.bf16 %v718_v26, %v717_v25  ;;  %v597_v58 = vmul.f32 %v3357_v55, %v3437_v40 }
  0xd3   : > { %2812 = vrot.lane.b32.xlu1 %v2811_v59, %s3143_s21  ;;  %v812_v22 = vpop.permute.xlu2 %811 }
  0xd4   : > { %v3368_v60 = vpop.permute.xlu1 %692 }
  0xd5   : > { %v3370_v61 = vpop.permute.xlu0 %690  ;;  %v3374_v63 = vsel %vm698_vm7, %v3368_v60, %v695_v62 }
  0xd6   : > { %4981 = vst [vmem:[#allocation10_spill] sm:$0xff] %v3374_v63  ;;  %v721_v7 = vmul.f32 %v3374_v63, %v3382_v3 }
  0xdc   : > { %v3376_v0 = vpop.permute.xlu1 %803 }
  0xdd   : > { %v3378_v1 = vpop.permute.xlu0 %696 }
  0xde   : > { %4982 = vst [vmem:[#allocation11_spill] sm:$0xff] %v3378_v1  ;;  %v3386_v4 = vsel %vm698_vm7, %v695_v62, %v3378_v1  ;;  %v723_v5 = vmul.f32 %v3378_v1, %v3326_v39 }
  0xdf   : > { %4983 = vst [vmem:[#allocation12_spill] sm:$0xff] %v3386_v4  ;;  %v722_v8 = vmul.f32 %v3386_v4, %v3380_v2 }
  0xe0   : > { %749 = vrot.lane.b32.xlu2 %v723_v5, %s3143_s21 }
  0xe1   : > { %v2826_v12 = vpack.i.bf16 %v722_v8, %v721_v7  ;;  %v2791_v7 = vpack.i.bf16 %v597_v58, %v596_v14  ;;  %v3465_v8 = vsel %vm579_vm6, %v3348_v48, %v3324_v33 }
  0xe2   : > { %4994 = vst [vmem:[#allocation23_spill] sm:$0xff] %v3465_v8  ;;  %v603_v25 = vmul.f32 %v3465_v8, %v3380_v2 }
  0xe3   : > { %2827 = vrot.lane.b32.xlu1 %v2826_v12, %s3143_s21  ;;  %v3470_v12 = vsel %vm579_vm6, %v3350_v49, %v3348_v48  ;;  %vm1801_vm6 = vcmask 1047816  }
  0xe4   : > { %v810_v17 = vpop.permute.xlu1 %809  ;;  %4995 = vst [vmem:[#allocation24_spill] sm:$0xff] %v3470_v12  ;;  %v602_v48 = vmul.f32 %v3470_v12, %v3382_v3 }
  0xe5   : > { %v3413_v18 = vpop.permute.xlu0 %801  ;;  %v3428_v31 = vsel %vm817_vm8, %v810_v17, %v812_v22 }
  0xe6   : > { %4986 = vst [vmem:[#allocation15_spill] sm:$0xff] %v3413_v18  ;;  %v3445_v50 = vsel %vm817_vm8, %v3413_v18, %v3376_v0  ;;  %v839_v52 = vmul.f32 %v3428_v31, %v3404_v11  ;;  %v834_v59 = vmul.f32 %v3413_v18, %v3355_v54  ;;  %v2806_v26 = vpack.i.bf16 %v603_v25, %v602_v48  ;;  %v3545_v48 = vpop.permute.xlu2 %922 }
  0xe7   : > { %4989 = vst [vmem:[#allocation18_spill] sm:$0xff] %v3428_v31  ;;  %v835_v62 = vmul.f32 %v3445_v50, %v3357_v55 }
  0xe8   : > { %2802 = vrot.lane.b32.xlu2 %v2801_v19, %s3142_s20  ;;  %4993 = vst [vmem:[#allocation22_spill] sm:$0xff] %v3445_v50  ;;  %v907_v19 = vperm.slane %v3257_v29, 4 }
  0xe9   : > { %v2831_v13 = vpack.i.bf16 %v835_v62, %v834_v59  ;;  %v3521_v59 = vsel %vm817_vm8, %v3376_v0, %v3398_v9  ;;  %v906_v0 = vperm.slane %v3262_v30, 4 }
  0xea   : > { %5001 = vst [vmem:[#allocation30_spill] sm:$0xff] %v3521_v59 }
  0xec   : > { %v3430_v32 = vpop.permute.xlu1 %815 }
  0xed   : > { %4990 = vst [vmem:[#allocation19_spill] sm:$0xff] %v3430_v32  ;;  %v842_v37 = vmul.f32 %v3430_v32, %v3326_v39  ;;  %v808_v38 = vpop.permute.xlu0 %807 }
  0xee   : > { %v3440_v45 = vsel %vm817_vm8, %v808_v38, %v810_v17 }
  0xef   : > { %4992 = vst [vmem:[#allocation21_spill] sm:$0xff] %v3440_v45  ;;  %v838_v53 = vmul.f32 %v3440_v45, %v3408_v15  ;;  %868 = vrot.lane.b32.xlu0 %v842_v37, %s3144_s22  ;;  %v3494_v37 = vsel %vm698_vm7, %v3353_v51, %v3370_v61  ;;  %v908_v51 = vperm.slane %v3251_v28, 4 }
  0xf0   : > { %2817 = vrot.lane.b32.xlu2 %v2816_v46, %s3143_s21  ;;  %4998 = vst [vmem:[#allocation27_spill] sm:$0xff] %v3494_v37  ;;  %v3499_v46 = vsel %vm698_vm7, %v3370_v61, %v3368_v60  ;;  %v719_v14 = vmul.f32 %v3494_v37, %v3408_v15  ;;  %v3512_v60 = vsel %vm817_vm8, %v3398_v9, %v808_v38  ;;  %v3113_v61 = vld [vmem:[%s4874_s2 + $0x40] ss:$0 sm:$0xff]  ;;  %v3114_v9 = vld [vmem:[%s4874_s2 + $0x48] ss:$0 sm:$0xff] }
  0xf1   : > { %v2841_v57 = vpack.i.bf16 %v839_v52, %v838_v53  ;;  %4999 = vst [vmem:[#allocation28_spill] sm:$0xff] %v3499_v46  ;;  %v910_v53 = vperm.slane %v3275_v35, 4  ;;  %v837_v62 = vmul.f32 %v3512_v60, %v3340_v44  ;;  %v836_v38 = vmul.f32 %v3521_v59, %v3338_v43 }
  0xf2   : > { %5000 = vst [vmem:[#allocation29_spill] sm:$0xff] %v3512_v60 }
  0xf3   : > { %2842 = vrot.lane.b32.xlu1 %v2841_v57, %s3144_s22  ;;  %v720_v57 = vmul.f32 %v3499_v46, %v3404_v11 }
  0xf4   : > { %v3543_v25 = vpop.permute.xlu1 %920 }
  0xf5   : > { %v814_v5 = vpop.permute.xlu0 %813  ;;  %v2821_v58 = vpack.i.bf16 %v720_v57, %v719_v14  ;;  %5002 = vst [vmem:[#allocation31_spill] sm:$0xff] %v3543_v25  ;;  %v1141_v57 = vperm.slane %v3244_v24, 6 }
  0xf6   : > { %v3473_v16 = vsel %vm817_vm8, %v812_v22, %v814_v5  ;;  %v3477_v17 = vsel %vm817_vm8, %v814_v5, %v3430_v32  ;;  %v911_v5 = vperm.slane %v3270_v34, 4 }
  0xf7   : > { %4996 = vst [vmem:[#allocation25_spill] sm:$0xff] %v3473_v16  ;;  %2792 = vrot.lane.b32.xlu0 %v2791_v7, %s3142_s20  ;;  %v840_v49 = vmul.f32 %v3473_v16, %v3382_v3  ;;  %v841_v22 = vmul.f32 %v3477_v17, %v3380_v2  ;;  %v2836_v7 = vpack.i.bf16 %v837_v62, %v836_v38  ;;  %v1262_v62 = vperm.slane %v3257_v29, 7 }
  0xf8   : > { %4997 = vst [vmem:[#allocation26_spill] sm:$0xff] %v3477_v17  ;;  %2832 = vrot.lane.b32.xlu2 %v2831_v13, %s3144_s22  ;;  %v1260_v13 = vperm.slane %v3238_v23, 7  ;;  %v1144_v38 = vperm.slane %v3257_v29, 6  ;;  %v1148_v17 = vperm.slane %v3270_v34, 6 }
  0xf9   : > { %v2846_v52 = vpack.i.bf16 %v841_v22, %v840_v49  ;;  %v909_v49 = vperm.slane %v3280_v36, 4  ;;  %v3116_v22 = vld [vmem:[%s4874_s2 + $0x50] ss:$0 sm:$0xff] }
  0xfb   : > { %926 = vrot.lane.b32.xlu1 %v907_v19, %s3137_s18  ;;  %v3115_v19 = vld [vmem:[%s4874_s2 + $0x60] ss:$0 sm:$0xff] }
  0xff   : > { %2807 = vrot.lane.b32.xlu0 %v2806_v26, %s3142_s20  ;;  %v3555_v26 = vsel %vm369_vm0, %v3543_v25, %v3545_v48 }
 0x100   : > { %2847 = vrot.lane.b32.xlu2 %v2846_v52, %s3144_s22  ;;  %5003 = vst [vmem:[#allocation32_spill] sm:$0xff] %v3555_v26  ;;  %v1261_v52 = vperm.slane %v3262_v30, 7  ;;  %v953_v14 = vmul.f32 %v3555_v26, %v3357_v55 }
 0x103   : > { %932 = vrot.lane.b32.xlu1 %v910_v53, %s3137_s18  ;;  %v952_v53 = vmul.f32 %v3543_v25, %v3355_v54 }
 0x107   : > { %2822 = vrot.lane.b32.xlu0 %v2821_v58, %s3143_s21  ;;  %v1022_v58 = vperm.slane %v3244_v24, 5 }
 0x108   : > { %928 = vrot.lane.b32.xlu2 %v908_v51, %s3137_s18  ;;  %v2851_v51 = vpack.i.bf16 %v953_v14, %v952_v53  ;;  %v1026_v14 = vperm.slane %v3251_v28, 5 }
 0x10b   : > { %1394 = vrot.lane.b32.xlu1 %v3113_v61, %s3145_s25  ;;  %v1259_v61 = vperm.slane %v3244_v24, 7  ;;  %v1025_v24 = vperm.slane %v3257_v29, 5 }
 0x10f   : > { %2837 = vrot.lane.b32.xlu0 %v2836_v7, %s3144_s22  ;;  %v1023_v7 = vperm.slane %v3238_v23, 5 }
 0x110   : > { %934 = vrot.lane.b32.xlu2 %v911_v5, %s3137_s18  ;;  %v3117_v5 = vld [vmem:[%s4874_s2 + $0x58] ss:$0 sm:$0xff] }
 0x113   : > { %1277 = vrot.lane.b32.xlu1 %v1260_v13, %s3146_s26 }
 0x117   : > { %924 = vrot.lane.b32.xlu0 %v906_v0, %s3137_s18 }
 0x118   : > { %1396 = vrot.lane.b32.xlu2 %v3114_v9, %s3145_s25  ;;  %v1142_v9 = vperm.slane %v3238_v23, 6  ;;  %v1263_v23 = vperm.slane %v3251_v28, 7 }
 0x11b   : > { %1402 = vrot.lane.b32.xlu1 %v3115_v19, %s3145_s25  ;;  %v1145_v19 = vperm.slane %v3251_v28, 6 }
 0x11f   : > { %930 = vrot.lane.b32.xlu0 %v909_v49, %s3137_s18  ;;  %v1264_v49 = vperm.slane %v3280_v36, 7 }
 0x120   : > { %1398 = vrot.lane.b32.xlu2 %v3116_v22, %s3145_s25 }
 0x123   : > { %1279 = vrot.lane.b32.xlu1 %v1261_v52, %s3146_s26 }
 0x127   : > { %2852 = vrot.lane.b32.xlu0 %v2851_v51, %s3147_s14  ;;  %v1146_v51 = vperm.slane %v3280_v36, 6 }
 0x128   : > { %1157 = vrot.lane.b32.xlu2 %v1141_v57, %s3148_s15 }
 0x12b   : > { %1038 = vrot.lane.b32.xlu1 %v1022_v58, %s3149_s16 }
 0x12f   : > { %1275 = vrot.lane.b32.xlu0 %v1259_v61, %s3146_s26 }
 0x130   : > { %1281 = vrot.lane.b32.xlu2 %v1262_v62, %s3146_s26 }
 0x132   : > { %v3580_v13 = vpop.permute.xlu1 %630 }
 0x133   : > { %1163 = vrot.lane.b32.xlu1 %v1144_v38, %s3148_s15  ;;  %v1143_v38 = vperm.slane %v3262_v30, 6 }
 0x137   : > { %1400 = vrot.lane.b32.xlu0 %v3117_v5, %s3145_s25  ;;  %v3118_v5 = vld [vmem:[%s4874_s2 + $0x70] ss:$0 sm:$0xff] }
 0x138   : > { %1040 = vrot.lane.b32.xlu2 %v1023_v7, %s3149_s16 }
 0x13a   : > { %v750_v0 = vpop.permute.xlu2 %749  ;;  %v3590_v22 = vpop.permute.xlu1 %2797 }
 0x13b   : > { %1044 = vrot.lane.b32.xlu1 %v1025_v24, %s3149_s16  ;;  %v4884_v29 = vunpack.i.h.bf16 %v3590_v22  ;;  %v1027_v24 = vperm.slane %v3280_v36, 5 }
 0x13f   : > { %1159 = vrot.lane.b32.xlu0 %v1142_v9, %s3148_s15 }
 0x140   : > { %1165 = vrot.lane.b32.xlu2 %v1145_v19, %s3148_s15  ;;  %v1024_v19 = vperm.slane %v3262_v30, 5  ;;  %v3119_v30 = vld [vmem:[%s4874_s2 + $0x68] ss:$0 sm:$0xff] }
 0x142   : > { %v3593_v52 = vpop.permute.xlu2 %2802 }
 0x143   : > { %v4886_v53 = vunpack.i.l.bf16 %v3593_v52  ;;  %1285 = vrot.lane.b32.xlu1 %v1264_v49, %s3146_s26  ;;  %v1265_v49 = vperm.slane %v3275_v35, 7 }
 0x145   : > { %v3605_v57 = vsel %vm632_vm9, %v4884_v29, %v4886_v53  ;;  %v3609_v58 = vpop.permute.xlu1 %2812  ;;  %v4894_v29 = vunpack.i.l.bf16 %v3590_v22  ;;  %v1266_v53 = vperm.slane %v3270_v34, 7 }
 0x146   : > { %v4889_v28 = vunpack.i.h.bf16 %v3609_v58 }
 0x147   : > { %1283 = vrot.lane.b32.xlu0 %v1263_v23, %s3146_s26 }
 0x148   : > { %1046 = vrot.lane.b32.xlu2 %v1026_v14, %s3149_s16 }
 0x14a   : > { %v3612_v61 = vpop.permute.xlu2 %2817 }
 0x14b   : > { %v4885_v62 = vunpack.i.l.bf16 %v3612_v61  ;;  %1167 = vrot.lane.b32.xlu1 %v1146_v51, %s3148_s15  ;;  %v1028_v51 = vperm.slane %v3275_v35, 5 }
 0x14d   : > { %v3626_v7 = vsel %vm751_vm10, %v4889_v28, %v4885_v62  ;;  %v4901_v28 = vunpack.i.h.bf16 %v3593_v52 }
 0x14f   : > { %1161 = vrot.lane.b32.xlu0 %v1143_v38, %s3148_s15  ;;  %v1147_v38 = vperm.slane %v3275_v35, 6  ;;  %v1029_v35 = vperm.slane %v3270_v34, 5  ;;  %v4904_v34 = vunpack.i.h.bf16 %v3612_v61 }
 0x150   : > { %1406 = vrot.lane.b32.xlu2 %v3118_v5, %s3145_s25 }
 0x152   : > { %v3631_v9 = vpop.permute.xlu2 %2832 }
 0x153   : > { %1048 = vrot.lane.b32.xlu1 %v1027_v24, %s3149_s16 }
 0x155   : > { %v3636_v23 = vpop.permute.xlu1 %2827 }
 0x156   : > { %v4882_v14 = vunpack.i.h.bf16 %v3636_v23  ;;  %v4907_v32 = vunpack.i.l.bf16 %v3636_v23 }
 0x157   : > { %1042 = vrot.lane.b32.xlu0 %v1024_v19, %s3149_s16 }
 0x158   : > { %1287 = vrot.lane.b32.xlu2 %v1265_v49, %s3146_s26  ;;  %v3645_v36 = vsel %vm751_vm10, %v4882_v14, %v750_v0  ;;  %v3120_v49 = vld [vmem:[%s4874_s2 + $0x78] ss:$0 sm:$0xff] }
 0x15a   : > { %v3652_v5 = vpop.permute.xlu2 %2847 }
 0x15b   : > { %1050 = vrot.lane.b32.xlu1 %v1028_v51, %s3149_s16  ;;  %v4883_v24 = vunpack.i.h.bf16 %v3652_v5 }
 0x15f   : > { %1404 = vrot.lane.b32.xlu0 %v3119_v30, %s3145_s25  ;;  %v4887_v30 = vunpack.i.l.bf16 %v3652_v5 }
 0x160   : > { %1169 = vrot.lane.b32.xlu2 %v1147_v38, %s3148_s15 }
 0x161   : > { %v869_v19 = vpop.permute.xlu0 %868 }
 0x162   : > { %v3660_v0 = vsel %vm870_vm11, %v4883_v24, %v869_v19  ;;  %v929_v19 = vpop.permute.xlu2 %928 }
 0x165   : > { %v3666_v51 = vpop.permute.xlu1 %2842 }
 0x166   : > { %v4888_v14 = vunpack.i.h.bf16 %v3666_v51 }
 0x167   : > { %1408 = vrot.lane.b32.xlu0 %v3120_v49, %s3145_s25  ;;  %s3150_s25 = smov 62  }
 0x168   : > { %1052 = vrot.lane.b32.xlu2 %v1029_v35, %s3149_s16  ;;  %v3677_v38 = vsel %vm870_vm11, %v4888_v14, %v4887_v30 }
 0x169   : > { %v3679_v24 = vpop.permute.xlu0 %2792 }
 0x16a   : > { %v4895_v62 = vunpack.i.h.bf16 %v3679_v24  ;;  %v3700_v4 = vpop.permute.xlu2 %934 }
 0x16b   : > { %5004 = vst [vmem:[#allocation33_spill] sm:$0xff] %v3700_v4 }
 0x16c   : > { %v3689_v49 = vsel %vm632_vm9, %v4895_v62, %v4894_v29 }
 0x16d   : > { %v927_v35 = vpop.permute.xlu1 %926 }
 0x16e   : > { %v3692_v30 = vsel %vm369_vm0, %v927_v35, %v929_v19 }
 0x16f   : > { %1289 = vrot.lane.b32.xlu0 %v1266_v53, %s3146_s26  ;;  %s3151_s26 = smov 63  }
 0x171   : > { %v3695_v14 = vpop.permute.xlu0 %2807 }
 0x172   : > { %v4900_v31 = vunpack.i.h.bf16 %v3695_v14  ;;  %v4899_v46 = vunpack.i.l.bf16 %v3695_v14 }
 0x174   : > { %v3708_v29 = vsel %vm632_vm9, %v4901_v28, %v4899_v46  ;;  %v3714_v53 = vsel %vm632_vm9, %v4900_v31, %v3580_v13  ;;  %v1397_v31 = vpop.permute.xlu2 %1396 }
 0x175   : > { %v3716_v62 = vpop.permute.xlu1 %932 }
 0x177   : > { %1171 = vrot.lane.b32.xlu0 %v1148_v17, %s3148_s15 }
 0x179   : > { %v3719_v1 = vpop.permute.xlu0 %2822 }
 0x17a   : > { %v4908_v56 = vunpack.i.h.bf16 %v3719_v1  ;;  %v4905_v46 = vunpack.i.l.bf16 %v3719_v1 }
 0x17c   : > { %v3730_v13 = vsel %vm751_vm10, %v4904_v34, %v4905_v46  ;;  %v3737_v17 = vsel %vm751_vm10, %v4908_v56, %v4907_v32  ;;  %v4917_v32 = vunpack.i.h.bf16 %v3631_v9  ;;  %v4919_v56 = vunpack.i.l.bf16 %v3666_v51  ;;  %v1399_v12 = vpop.permute.xlu2 %1398 }
 0x17d   : > { %v3739_v28 = vpop.permute.xlu1 %1394  ;;  %v3807_v21 = vsel %vm1410_vm12, %v1397_v31, %v1399_v12 }
 0x17e   : > { %5005 = vst [vmem:[#allocation34_spill] sm:$0xff] %v3739_v28  ;;  %v3743_v63 = vsel %vm1410_vm12, %v3739_v28, %v1397_v31  ;;  %v1427_v50 = vmul.f32 %v3739_v28, %v3355_v54 }
 0x17f   : > { %5006 = vst [vmem:[#allocation35_spill] sm:$0xff] %v3743_v63  ;;  %v1428_v34 = vmul.f32 %v3743_v63, %v3357_v55 }
 0x180   : > { %5012 = vst [vmem:[#allocation41_spill] sm:$0xff] %v3807_v21 }
 0x181   : > { %v3749_v46 = vpop.permute.xlu0 %2837  ;;  %v2856_v16 = vpack.i.bf16 %v1428_v34, %v1427_v50 }
 0x182   : > { %v4918_v26 = vunpack.i.h.bf16 %v3749_v46  ;;  %v4916_v33 = vunpack.i.l.bf16 %v3749_v46 }
 0x183   : > { %2857 = vrot.lane.b32.xlu0 %v2856_v16, %s3150_s25 }
 0x184   : > { %v3761_v63 = vsel %vm870_vm11, %v4917_v32, %v4916_v33  ;;  %v3768_v50 = vsel %vm870_vm11, %v4918_v26, %v4919_v56  ;;  %v3785_v26 = vpop.permute.xlu2 %1157 }
 0x185   : > { %v1278_v34 = vpop.permute.xlu1 %1277  ;;  %5008 = vst [vmem:[#allocation37_spill] sm:$0xff] %v3785_v26 }
 0x189   : > { %v3770_v47 = vpop.permute.xlu0 %924 }
 0x18a   : > { %v3774_v16 = vsel %vm369_vm0, %v3770_v47, %v927_v35 }
 0x18c   : > { %v3791_v35 = vpop.permute.xlu2 %1281 }
 0x18d   : > { %v3776_v37 = vpop.permute.xlu1 %1402 }
 0x191   : > { %v931_v8 = vpop.permute.xlu0 %930 }
 0x192   : > { %v3779_v33 = vsel %vm369_vm0, %v929_v19, %v931_v8  ;;  %v3783_v32 = vsel %vm369_vm0, %v931_v8, %v3716_v62 }
 0x193   : > { %5007 = vst [vmem:[#allocation36_spill] sm:$0xff] %v3779_v33 }
 0x194   : > { %v1041_v20 = vpop.permute.xlu2 %1040 }
 0x195   : > { %v1280_v56 = vpop.permute.xlu1 %1279 }
 0x196   : > { %v3821_v31 = vsel %vm1291_vm13, %v1280_v56, %v3791_v35 }
 0x197   : > { %5015 = vst [vmem:[#allocation44_spill] sm:$0xff] %v3821_v31 }
 0x199   : > { %v3787_v18 = vpop.permute.xlu0 %2852 }
 0x19d   : > { %v3789_v25 = vpop.permute.xlu1 %1038 }
 0x19e   : > { %5009 = vst [vmem:[#allocation38_spill] sm:$0xff] %v3789_v25 }
 0x1a1   : > { %v3793_v45 = vpop.permute.xlu0 %1275 }
 0x1a2   : > { %5010 = vst [vmem:[#allocation39_spill] sm:$0xff] %v3793_v45  ;;  %v3797_v19 = vsel %vm1291_vm13, %v3793_v45, %v1278_v34  ;;  %v1308_v8 = vmul.f32 %v3793_v45, %v3355_v54  ;;  %v1429_v45 = vmul.f32 %v3807_v21, %v3338_v43 }
 0x1a3   : > { %5011 = vst [vmem:[#allocation40_spill] sm:$0xff] %v3797_v19  ;;  %v1309_v6 = vmul.f32 %v3797_v19, %v3357_v55 }
 0x1a5   : > { %v3803_v10 = vpop.permute.xlu1 %1163  ;;  %v2861_v28 = vpack.i.bf16 %v1309_v6, %v1308_v8  ;;  %v3817_v6 = vsel %vm1291_vm13, %v1278_v34, %v1280_v56  ;;  %v1190_v34 = vmul.f32 %v3785_v26, %v3355_v54 }
 0x1a6   : > { %5014 = vst [vmem:[#allocation43_spill] sm:$0xff] %v3817_v6 }
 0x1a7   : > { %2862 = vrot.lane.b32.xlu1 %v2861_v28, %s3151_s26  ;;  %v1311_v28 = vmul.f32 %v3821_v31, %v3340_v44  ;;  %v3842_v31 = vsel %vm1054_vm15, %v3789_v25, %v1041_v20 }
 0x1a8   : > { %5017 = vst [vmem:[#allocation46_spill] sm:$0xff] %v3842_v31  ;;  %v1072_v21 = vmul.f32 %v3842_v31, %v3357_v55 }
 0x1a9   : > { %v1401_v60 = vpop.permute.xlu0 %1400 }
 0x1aa   : > { %v3810_v59 = vsel %vm1410_vm12, %v1399_v12, %v1401_v60  ;;  %v1310_v12 = vmul.f32 %v3817_v6, %v3338_v43 }
 0x1ab   : > { %5013 = vst [vmem:[#allocation42_spill] sm:$0xff] %v3810_v59  ;;  %v1430_v19 = vmul.f32 %v3810_v59, %v3340_v44 }
 0x1ac   : > { %v2881_v59 = vpack.i.bf16 %v1311_v28, %v1310_v12 }
 0x1ad   : > { %v1045_v42 = vpop.permute.xlu1 %1044  ;;  %v2866_v41 = vpack.i.bf16 %v1430_v19, %v1429_v45  ;;  %v3834_v19 = vpop.permute.xlu2 %1165 }
 0x1af   : > { %2867 = vrot.lane.b32.xlu2 %v2866_v41, %s3150_s25 }
 0x1b1   : > { %v1160_v8 = vpop.permute.xlu0 %1159 }
 0x1b2   : > { %v3830_v45 = vsel %vm1173_vm14, %v3785_v26, %v1160_v8  ;;  %v1071_v26 = vmul.f32 %v3789_v25, %v3355_v54 }
 0x1b3   : > { %5016 = vst [vmem:[#allocation45_spill] sm:$0xff] %v3830_v45  ;;  %v1191_v41 = vmul.f32 %v3830_v45, %v3357_v55 }
 0x1b5   : > { %v3838_v56 = vpop.permute.xlu1 %1285  ;;  %v2876_v6 = vpack.i.bf16 %v1191_v41, %v1190_v34  ;;  %v1047_v45 = vpop.permute.xlu2 %1046  ;;  %v2891_v34 = vpack.i.bf16 %v1072_v21, %v1071_v26 }
 0x1b7   : > { %2877 = vrot.lane.b32.xlu1 %v2876_v6, %s3148_s15  ;;  %2882 = vrot.lane.b32.xlu2 %v2881_v59, %s3151_s26 }
 0x1b9   : > { %v1284_v40 = vpop.permute.xlu0 %1283 }
 0x1bd   : > { %v3850_v27 = vpop.permute.xlu1 %1167  ;;  %v1407_v26 = vpop.permute.xlu2 %1406 }
 0x1bf   : > { %2892 = vrot.lane.b32.xlu1 %v2891_v34, %s3152_s12 }
 0x1c1   : > { %v1162_v12 = vpop.permute.xlu0 %1161 }
 0x1c2   : > { %v3854_v28 = vsel %vm1173_vm14, %v1160_v8, %v1162_v12  ;;  %v3858_v59 = vsel %vm1173_vm14, %v1162_v12, %v3803_v10  ;;  %v3869_v8 = vsel %vm1054_vm15, %v1045_v42, %v1047_v45 }
 0x1c3   : > { %5018 = vst [vmem:[#allocation47_spill] sm:$0xff] %v3858_v59  ;;  %v1192_v54 = vmul.f32 %v3854_v28, %v3338_v43  ;;  %v1193_v55 = vmul.f32 %v3858_v59, %v3340_v44 }
 0x1c4   : > { %5020 = vst [vmem:[#allocation49_spill] sm:$0xff] %v3869_v8 }
 0x1c5   : > { %v1049_v6 = vpop.permute.xlu1 %1048  ;;  %v2896_v41 = vpack.i.bf16 %v1193_v55, %v1192_v54  ;;  %v1075_v54 = vmul.f32 %v3869_v8, %v3408_v15 }
 0x1c6   : > { %v3865_v21 = vsel %vm1054_vm15, %v1047_v45, %v1049_v6 }
 0x1c7   : > { %5019 = vst [vmem:[#allocation48_spill] sm:$0xff] %v3865_v21  ;;  %2897 = vrot.lane.b32.xlu2 %v2896_v41, %s3148_s15  ;;  %v1076_v34 = vmul.f32 %v3865_v21, %v3404_v11 }
 0x1c9   : > { %v1043_v12 = vpop.permute.xlu0 %1042  ;;  %v2911_v59 = vpack.i.bf16 %v1076_v34, %v1075_v54  ;;  %v956_v34 = vmul.f32 %v3692_v30, %v3408_v15 }
 0x1ca   : > { %v3874_v31 = vsel %vm1054_vm15, %v1041_v20, %v1043_v12  ;;  %v3877_v25 = vsel %vm1054_vm15, %v1043_v12, %v1045_v42  ;;  %v3889_v20 = vsel %vm1410_vm12, %v1401_v60, %v3776_v37  ;;  %v957_v42 = vmul.f32 %v3779_v33, %v3404_v11  ;;  %v1288_v12 = vpop.permute.xlu2 %1287 }
 0x1cb   : > { %v1073_v55 = vmul.f32 %v3874_v31, %v3338_v43  ;;  %v1074_v45 = vmul.f32 %v3877_v25, %v3340_v44  ;;  %v1431_v54 = vmul.f32 %v3889_v20, %v3408_v15 }
 0x1cd   : > { %v2906_v41 = vpack.i.bf16 %v1074_v45, %v1073_v55  ;;  %v2921_v55 = vpack.i.bf16 %v957_v42, %v956_v34  ;;  %v3905_v45 = vsel %vm1291_vm13, %v3791_v35, %v1284_v40 }
 0x1ce   : > { %v1312_v33 = vmul.f32 %v3905_v45, %v3408_v15 }
 0x1cf   : > { %2907 = vrot.lane.b32.xlu1 %v2906_v41, %s3152_s12  ;;  %2912 = vrot.lane.b32.xlu2 %v2911_v59, %s3152_s12  ;;  %v3909_v41 = vsel %vm1291_vm13, %v1284_v40, %v3838_v56 }
 0x1d0   : > { %v1313_v42 = vmul.f32 %v3909_v41, %v3404_v11 }
 0x1d1   : > { %v1405_v21 = vpop.permute.xlu0 %1404 }
 0x1d2   : > { %v3895_v8 = vsel %vm1410_vm12, %v3776_v37, %v1405_v21  ;;  %v3914_v37 = vsel %vm1410_vm12, %v1405_v21, %v1407_v26  ;;  %v1170_v40 = vpop.permute.xlu2 %1169 }
 0x1d3   : > { %v1432_v59 = vmul.f32 %v3895_v8, %v3404_v11  ;;  %5021 = vst [vmem:[#allocation50_spill] sm:$0xff] %v3914_v37 }
 0x1d5   : > { %v2871_v60 = vpack.i.bf16 %v1432_v59, %v1431_v54  ;;  %v1433_v54 = vmul.f32 %v3914_v37, %v3382_v3  ;;  %v2886_v59 = vpack.i.bf16 %v1313_v42, %v1312_v33  ;;  %v3944_v37 = vsel %vm1291_vm13, %v3838_v56, %v1288_v12 }
 0x1d6   : > { %5023 = vst [vmem:[#allocation52_spill] sm:$0xff] %v3944_v37 }
 0x1d7   : > { %2872 = vrot.lane.b32.xlu0 %v2871_v60, %s3150_s25  ;;  %2922 = vrot.lane.b32.xlu1 %v2921_v55, %s3147_s14  ;;  %v3933_v55 = vsel %vm1173_vm14, %v3834_v19, %v3850_v27 }
 0x1d8   : > { %5022 = vst [vmem:[#allocation51_spill] sm:$0xff] %v3933_v55  ;;  %v1195_v33 = vmul.f32 %v3933_v55, %v3404_v11 }
 0x1d9   : > { %v3920_v34 = vpop.permute.xlu0 %1408 }
 0x1da   : > { %v3924_v35 = vsel %vm1410_vm12, %v1407_v26, %v3920_v34  ;;  %v3940_v26 = vsel %vm1173_vm14, %v3803_v10, %v3834_v19  ;;  %v1314_v10 = vmul.f32 %v3944_v37, %v3382_v3  ;;  %v1051_v19 = vpop.permute.xlu1 %1050 }
 0x1db   : > { %v1434_v21 = vmul.f32 %v3924_v35, %v3380_v2 }
 0x1dd   : > { %v2926_v60 = vpack.i.bf16 %v1434_v21, %v1433_v54  ;;  %v1194_v21 = vmul.f32 %v3940_v26, %v3408_v15  ;;  %v3970_v15 = vsel %vm1054_vm15, %v1049_v6, %v1051_v19 }
 0x1df   : > { %2887 = vrot.lane.b32.xlu0 %v2886_v59, %s3151_s26  ;;  %2927 = vrot.lane.b32.xlu2 %v2926_v60, %s3150_s25  ;;  %v3960_v59 = vpop.permute.xlu2 %1052  ;;  %v2901_v60 = vpack.i.bf16 %v1195_v33, %v1194_v21 }
 0x1e0   : > { %v3974_v37 = vsel %vm1054_vm15, %v1051_v19, %v3960_v59 }
 0x1e1   : > { %v3948_v42 = vpop.permute.xlu0 %1289  ;;  %5024 = vst [vmem:[#allocation53_spill] sm:$0xff] %v3974_v37  ;;  %v1078_v6 = vmul.f32 %v3974_v37, %v3380_v2 }
 0x1e2   : > { %v3952_v54 = vsel %vm1291_vm13, %v1288_v12, %v3948_v42  ;;  %v1316_v11 = vmul.f32 %v3948_v42, %v3326_v39  ;;  %v3967_v12 = vsel %vm369_vm0, %v3545_v48, %v3770_v47  ;;  %v955_v47 = vmul.f32 %v3774_v16, %v3340_v44 }
 0x1e3   : > { %v1315_v56 = vmul.f32 %v3952_v54, %v3380_v2  ;;  %v954_v33 = vmul.f32 %v3967_v12, %v3338_v43  ;;  %v1077_v48 = vmul.f32 %v3970_v15, %v3382_v3  ;;  %v3997_v43 = vsel %vm369_vm0, %v3716_v62, %v3700_v4 }
 0x1e4   : > { %5026 = vst [vmem:[#allocation55_spill] sm:$0xff] %v3997_v43  ;;  %v958_v44 = vmul.f32 %v3783_v32, %v3382_v3 }
 0x1e5   : > { %v2931_v55 = vpack.i.bf16 %v1315_v56, %v1314_v10  ;;  %v2916_v10 = vpack.i.bf16 %v955_v47, %v954_v33  ;;  %v2941_v19 = vpack.i.bf16 %v1078_v6, %v1077_v48 }
 0x1e7   : > { %2902 = vrot.lane.b32.xlu0 %v2901_v60, %s3148_s15  ;;  %1342 = vrot.lane.b32.xlu2 %v1316_v11, %s3151_s26  ;;  %v960_v11 = vmul.f32 %v3700_v4, %v3326_v39  ;;  %v1435_v60 = vmul.f32 %v3920_v34, %v3326_v39 }
 0x1e8   : > { %2932 = vrot.lane.b32.xlu1 %v2931_v55, %s3151_s26  ;;  %v959_v55 = vmul.f32 %v3997_v43, %v3380_v2 }
 0x1e9   : > { %v3987_v21 = vpop.permute.xlu0 %1171 }
 0x1ea   : > { %5025 = vst [vmem:[#allocation54_spill] sm:$0xff] %v3987_v21  ;;  %v1198_v56 = vmul.f32 %v3987_v21, %v3326_v39  ;;  %v4009_v47 = vsel %vm1173_vm14, %v1170_v40, %v3987_v21  ;;  %v2946_v6 = vpack.i.bf16 %v959_v55, %v958_v44  ;;  %v1079_v55 = vmul.f32 %v3960_v59, %v3326_v39 }
 0x1eb   : > { %5027 = vst [vmem:[#allocation56_spill] sm:$0xff] %v4009_v47 }
 0x1ef   : > { %2917 = vrot.lane.b32.xlu0 %v2916_v10, %s3147_s14  ;;  %2942 = vrot.lane.b32.xlu2 %v2941_v19, %s3152_s12  ;;  %v4015_v10 = vsel %vm1173_vm14, %v3850_v27, %v1170_v40 }
 0x1f0   : > { %1224 = vrot.lane.b32.xlu1 %v1198_v56, %s3148_s15  ;;  %v1197_v56 = vmul.f32 %v4009_v47, %v3380_v2 }
 0x1f5   : > { %v2858_v33 = vpop.permute.xlu0 %2857 }
 0x1f6   : > { %v2860_v62 = vunpack.i.h.bf16 %v2858_v33  ;;  %v2859_v48 = vunpack.i.l.bf16 %v2858_v33  ;;  %v1196_v33 = vmul.f32 %v4015_v10, %v3382_v3 }
 0x1f7   : > { %1461 = vrot.lane.b32.xlu0 %v1435_v60, %s3150_s25  ;;  %986 = vrot.lane.b32.xlu2 %v960_v11, %s3147_s14 }
 0x1f8   : > { %2947 = vrot.lane.b32.xlu1 %v2946_v6, %s3147_s14  ;;  %v1464_v19 = vsel %vm1463_vm1, %v2859_v48, %v2860_v62  ;;  %v2936_v44 = vpack.i.bf16 %v1197_v56, %v1196_v33 }
 0x1f9   : > { %1572 = vmatpush.msra.mxu0 %v1464_v19 }
 0x1ff   : > { %2937 = vrot.lane.b32.xlu0 %v2936_v44, %s3148_s15 }
 0x207   : > { %1105 = vrot.lane.b32.xlu0 %v1079_v55, %s3152_s12 }
 0x209   : > { %v4027_v27 = vpop.permute.xlu2 %2867 }
 0x20a   : > { %v4953_v40 = vunpack.i.h.bf16 %v4027_v27  ;;  %v2869_v11 = vunpack.i.l.bf16 %v4027_v27 }
 0x20c   : > { %v1465_v2 = vsel %vm1463_vm1, %v2860_v62, %v2869_v11  ;;  %v1466_v3 = vsel %vm1463_vm1, %v2869_v11, %v4953_v40 }
 0x20d   : > { %1592 = vmatpush.msra.mxu1 %v1465_v2  ;;  %1612 = vmatpush.msra.mxu2 %v1466_v3 }
 0x211   : > { %v4035_v60 = vpop.permute.xlu2 %2882 }
 0x212   : > { %v4951_v39 = vunpack.i.h.bf16 %v4035_v60  ;;  %v2884_v48 = vunpack.i.l.bf16 %v4035_v60 }
 0x214   : > { %v1347_v6 = vsel %vm1344_vm2, %v2884_v48, %v4951_v39 }
 0x215   : > { %1613 = vmatpush.msra.mxu2 %v1347_v6 }
 0x219   : > { %v2863_v19 = vpop.permute.xlu1 %2862 }
 0x21a   : > { %v2865_v62 = vunpack.i.h.bf16 %v2863_v19  ;;  %v2864_v56 = vunpack.i.l.bf16 %v2863_v19 }
 0x21c   : > { %v1345_v33 = vsel %vm1344_vm2, %v2864_v56, %v2865_v62  ;;  %v1346_v44 = vsel %vm1344_vm2, %v2865_v62, %v2884_v48  ;;  %v1725_v48 = vld [vmem:[%s4876_s4] sm:$0xff] }
 0x21d   : > { %1573 = vmatpush.msra.mxu0 %v1345_v33  ;;  %1593 = vmatpush.msra.mxu1 %v1346_v44  ;;  %v1739_v62 = vld [vmem:[%s4877_s5] sm:$0xff]  ;;  %v3153_v44 = vmov 0  }
 0x21e   : > { %2951 = vset.pattern.permute.xlu0 %v3153_v44  ;;  %2952 = vset.pattern.permute.xlu1 %v3153_v44  ;;  %v4074_v44 = vld [vmem:[%s4874_s2] sm:$0xff] }
 0x21f   : > { %1728 = vperm.xlu0 %2951, %v1725_v48   ;;  %1742 = vperm.xlu1 %2952, %v1739_v62   ;;  %v2794_v62 = vunpack.i.l.bf16 %v3679_v24  ;;  %5029 = vst [vmem:[#allocation57_spill] sm:$0xff] %v4074_v44 }
 0x221   : > { %v4044_v55 = vpop.permute.xlu2 %2897 }
 0x222   : > { %v4952_v11 = vunpack.i.h.bf16 %v4044_v55  ;;  %v2899_v2 = vunpack.i.l.bf16 %v4044_v55 }
 0x224   : > { %v1228_v3 = vsel %vm1173_vm14, %v2899_v2, %v4952_v11  ;;  %v2854_v11 = vunpack.i.l.bf16 %v3787_v18 }
 0x225   : > { %1614 = vmatpush.msra.mxu2 %v1228_v3 }
 0x229   : > { %v2878_v6 = vpop.permute.xlu1 %2877 }
 0x22a   : > { %v2880_v39 = vunpack.i.h.bf16 %v2878_v6  ;;  %v2879_v19 = vunpack.i.l.bf16 %v2878_v6  ;;  %v4957_v6 = vunpack.i.h.bf16 %v3787_v18 }
 0x22c   : > { %v1226_v56 = vsel %vm1173_vm14, %v2879_v19, %v2880_v39  ;;  %v1227_v33 = vsel %vm1173_vm14, %v2880_v39, %v2899_v2  ;;  %v2834_v19 = vunpack.i.l.bf16 %v3631_v9  ;;  %v2814_v2 = vunpack.i.l.bf16 %v3609_v58 }
 0x22d   : > { %1574 = vmatpush.msra.mxu0 %v1226_v56  ;;  %1594 = vmatpush.msra.mxu1 %v1227_v33  ;;  %v989_v48 = vsel %vm988_vm4, %v2854_v11, %v4957_v6  ;;  %v5028_v56 = vunpack.i.h.bf16 %v3631_v9  ;;  %v506_v11 = vld [vmem:[#allocation2] sm:$0xff] }
 0x22f   : > { %v871_v33 = vsel %vm870_vm11, %v2834_v19, %v5028_v56  ;;  %v4088_v56 = vld [vmem:[%s4875_s3] sm:$0xff] }
 0x231   : > { %v2893_v3 = vpop.permute.xlu1 %2892 }
 0x232   : > { %v2895_v40 = vunpack.i.h.bf16 %v2893_v3  ;;  %v2894_v43 = vunpack.i.l.bf16 %v2893_v3  ;;  %v5030_v3 = vunpack.i.h.bf16 %v3609_v58 }
 0x234   : > { %v1108_v39 = vsel %vm1107_vm3, %v2894_v43, %v2895_v40  ;;  %v4955_v43 = vperm.slane %v4074_v44, 0 }
 0x235   : > { %1575 = vmatpush.msra.mxu0 %v1108_v39  ;;  %v752_v39 = vsel %vm751_vm10, %v2814_v2, %v5030_v3 }
 0x236   : > { %v522_v19 = vmul.f32 %v4955_v43, %v506_v11 }
 0x237   : > { %1576 = vmatpush.msra.mxu0 %v989_v48  ;;  %v5031_v48 = vunpack.i.h.bf16 %v3679_v24 }
 0x239   : > { %1577 = vmatpush.msra.mxu0 %v871_v33  ;;  %v633_v9 = vsel %vm632_vm9, %v2794_v62, %v5031_v48  ;;  %v5032_v48 = vunpack.i.h.bf16 %v4027_v27  ;;  %v5033_v27 = vunpack.i.h.bf16 %v4035_v60 }
 0x23b   : > { %1578 = vmatpush.msra.mxu0 %v752_v39 }
 0x23d   : > { %1579 = vmatpush.msra.mxu0 %v633_v9 }
 0x23f   : > { %1580 = vmatpush.msra.mxu0 %v522_v19 }
 0x240   : > { %2745 = vmatmul.msk.f32.vlgmr.msra.gmra.mxu0 %vm1561_vm5, %v4088_v56 }
 0x241   : > { %v2908_v58 = vpop.permute.xlu1 %2907 }
 0x242   : > { %v2910_v2 = vunpack.i.h.bf16 %v2908_v58  ;;  %v2909_v33 = vunpack.i.l.bf16 %v2908_v58  ;;  %v4106_v58 = vpop.permute.xlu2 %2912 }
 0x243   : > { %v2914_v43 = vunpack.i.l.bf16 %v4106_v58 }
 0x244   : > { %v1109_v24 = vsel %vm1107_vm3, %v2895_v40, %v2909_v33  ;;  %v1110_v62 = vsel %vm1107_vm3, %v2909_v33, %v2910_v2 }
 0x245   : > { %1595 = vmatpush.msra.mxu1 %v1109_v24  ;;  %1615 = vmatpush.msra.mxu2 %v1110_v62 }
 0x249   : > { %v4094_v3 = vpop.permute.xlu0 %2872  ;;  %v4110_v62 = vpop.permute.xlu1 %2922 }
 0x24a   : > { %v4956_v39 = vunpack.i.h.bf16 %v4094_v3  ;;  %v2874_v11 = vunpack.i.l.bf16 %v4094_v3  ;;  %v2924_v44 = vunpack.i.l.bf16 %v4110_v62  ;;  %v5035_v4 = vunpack.i.h.bf16 %v4110_v62 }
 0x24c   : > { %v1467_v9 = vsel %vm1463_vm1, %v5032_v48, %v2874_v11  ;;  %v1468_v19 = vsel %vm1463_vm1, %v2874_v11, %v4956_v39  ;;  %v4122_v39 = vpop.permute.xlu2 %2927 }
 0x24d   : > { %1632 = vmatpush.msra.mxu3 %v1467_v9  ;;  %1652 = vmatpush.msrb.mxu0 %v1468_v19  ;;  %v2915_v19 = vunpack.i.h.bf16 %v4106_v58 }
 0x251   : > { %v4104_v40 = vpop.permute.xlu0 %2887 }
 0x252   : > { %v4960_v33 = vunpack.i.h.bf16 %v4104_v40  ;;  %v2889_v24 = vunpack.i.l.bf16 %v4104_v40 }
 0x254   : > { %v1348_v48 = vsel %vm1344_vm2, %v5033_v27, %v2889_v24  ;;  %v1349_v11 = vsel %vm1344_vm2, %v2889_v24, %v4960_v33  ;;  %v5034_v24 = vunpack.i.h.bf16 %v4044_v55  ;;  %v1111_v33 = vsel %vm1107_vm3, %v2910_v2, %v2914_v43 }
 0x255   : > { %1633 = vmatpush.msra.mxu3 %v1348_v48  ;;  %1653 = vmatpush.msrb.mxu0 %v1349_v11  ;;  %v1112_v27 = vsel %vm1107_vm3, %v2914_v43, %v2915_v19  ;;  %v993_v55 = vsel %vm988_vm4, %v2924_v44, %v5035_v4  ;;  %v5038_v43 = vunpack.i.h.bf16 %v3787_v18 }
 0x259   : > { %v4118_v9 = vpop.permute.xlu0 %2902 }
 0x25a   : > { %v2905_v6 = vunpack.i.h.bf16 %v4118_v9  ;;  %v2904_v60 = vunpack.i.l.bf16 %v4118_v9  ;;  %v4128_v47 = vpop.permute.xlu1 %2932  ;;  %v5051_v9 = vunpack.i.h.bf16 %v4110_v62  ;;  %v4267_v62 = vld [vmem:[%s4874_s2 + $0x28] sm:$0xff] }
 0x25c   : > { %v1229_v48 = vsel %vm1173_vm14, %v5034_v24, %v2904_v60  ;;  %v1230_v11 = vsel %vm1173_vm14, %v2904_v60, %v2905_v6  ;;  %v5036_v60 = vunpack.i.h.bf16 %v3666_v51 }
 0x25d   : > { %1634 = vmatpush.msra.mxu3 %v1229_v48  ;;  %1654 = vmatpush.msrb.mxu0 %v1230_v11  ;;  %v5037_v48 = vunpack.i.l.bf16 %v3666_v51  ;;  %v4148_v11 = vpop.permute.xlu2 %1342 }
 0x25f   : > { %1635 = vmatpush.msra.mxu3 %v1111_v33  ;;  %1655 = vmatpush.msrb.mxu0 %v1112_v27  ;;  %v875_v2 = vsel %vm870_vm11, %v5037_v48, %v5036_v60  ;;  %v5040_v60 = vunpack.i.l.bf16 %v3719_v1  ;;  %v510_v48 = vld [vmem:[#allocation2 + $0x20] sm:$0xff] }
 0x261   : > { %v2918_v21 = vpop.permute.xlu0 %2917  ;;  %1656 = vmatpush.msrb.mxu0 %v993_v55  ;;  %v5039_v55 = vunpack.i.h.bf16 %v3719_v1  ;;  %v5044_v1 = vunpack.i.l.bf16 %v3593_v52 }
 0x262   : > { %v2920_v24 = vunpack.i.h.bf16 %v2918_v21  ;;  %v2919_v37 = vunpack.i.l.bf16 %v2918_v21  ;;  %v4158_v21 = vld [vmem:[%s4874_s2 + $0x20] sm:$0xff] }
 0x263   : > { %1657 = vmatpush.msrb.mxu0 %v875_v2  ;;  %v4965_v51 = vperm.slane %v4158_v21, 0  ;;  %v756_v18 = vsel %vm751_vm10, %v5040_v60, %v5039_v55  ;;  %v4166_v2 = vpop.permute.xlu1 %1224  ;;  %v507_v60 = vld [vmem:[#allocation2 + $0x8] sm:$0xff] }
 0x264   : > { %v990_v33 = vsel %vm988_vm4, %v5038_v43, %v2919_v37  ;;  %v991_v27 = vsel %vm988_vm4, %v2919_v37, %v2920_v24  ;;  %v992_v4 = vsel %vm988_vm4, %v2920_v24, %v2924_v44  ;;  %v5041_v37 = vunpack.i.h.bf16 %v3749_v46 }
 0x265   : > { %1596 = vmatpush.msra.mxu1 %v990_v33  ;;  %1616 = vmatpush.msra.mxu2 %v991_v27  ;;  %v5042_v44 = vunpack.i.l.bf16 %v3749_v46  ;;  %v5043_v43 = vunpack.i.h.bf16 %v3593_v52  ;;  %v4182_v27 = vld [vmem:[%s4874_s2 + $0x8] sm:$0xff]  ;;  %v5045_v46 = vunpack.i.h.bf16 %v3612_v61  ;;  %v526_v52 = vmul.f32 %v4965_v51, %v510_v48  ;;  %v508_v48 = vld [vmem:[#allocation2 + $0x10] sm:$0xff] }
 0x266   : > { %1636 = vmatpush.msra.mxu3 %v992_v4  ;;  %1658 = vmatpush.msrb.mxu0 %v756_v18  ;;  %v515_v4 = vperm.slane %v4182_v27, 0  ;;  %v4196_v18 = vld [vmem:[%s4874_s2 + $0x10] sm:$0xff] }
 0x267   : > { %v873_v24 = vsel %vm870_vm11, %v5042_v44, %v5041_v37  ;;  %1597 = vmatpush.msra.mxu1 %v3761_v63  ;;  %v637_v33 = vsel %vm632_vm9, %v5044_v1, %v5043_v43  ;;  %v5046_v63 = vunpack.i.l.bf16 %v3612_v61  ;;  %v516_v37 = vperm.slane %v4196_v18, 0 }
 0x268   : > { %1617 = vmatpush.msra.mxu2 %v873_v24  ;;  %1637 = vmatpush.msra.mxu3 %v3768_v50  ;;  %v4202_v50 = vld [vmem:[%s4874_s2 + $0x18] sm:$0xff]  ;;  %v509_v24 = vld [vmem:[#allocation2 + $0x18] sm:$0xff]  ;;  %v5047_v43 = vunpack.i.h.bf16 %v3590_v22  ;;  %v5048_v1 = vunpack.i.l.bf16 %v3590_v22  ;;  %v2934_v22 = vunpack.i.l.bf16 %v4128_v47 }
 0x269   : > { %1659 = vmatpush.msrb.mxu0 %v637_v33  ;;  %v754_v55 = vsel %vm751_vm10, %v5046_v63, %v5045_v46  ;;  %v517_v61 = vperm.slane %v4202_v50, 0  ;;  %v1462_v44 = vpop.permute.xlu0 %1461  ;;  %1598 = vmatpush.msra.mxu1 %v3626_v7  ;;  %v523_v7 = vmul.f32 %v515_v4, %v507_v60  ;;  %v2930_v46 = vunpack.i.h.bf16 %v4122_v39 }
 0x26a   : > { %1618 = vmatpush.msra.mxu2 %v754_v55  ;;  %1638 = vmatpush.msra.mxu3 %v3730_v13  ;;  %v635_v33 = vsel %vm632_vm9, %v5048_v1, %v5047_v43  ;;  %v2929_v63 = vunpack.i.l.bf16 %v4122_v39  ;;  %v524_v13 = vmul.f32 %v516_v37, %v508_v48  ;;  %v2943_v55 = vpop.permute.xlu2 %2942  ;;  %v5050_v1 = vunpack.i.h.bf16 %v4104_v40 }
 0x26b   : > { %1660 = vmatpush.msrb.mxu0 %v526_v52  ;;  %1599 = vmatpush.msra.mxu1 %v3689_v49  ;;  %v525_v49 = vmul.f32 %v517_v61, %v509_v24  ;;  %v2935_v52 = vunpack.i.h.bf16 %v4128_v47  ;;  %v2948_v60 = vpop.permute.xlu1 %2947  ;;  %v1471_v47 = vsel %vm1463_vm1, %v2930_v46, %v1462_v44  ;;  %v2945_v24 = vunpack.i.h.bf16 %v2943_v55 }
 0x26c   : > { %2749 = vmatmul.msk.f32.vlgmr.msrb.gmra.mxu0 %vm1561_vm5, %v4088_v56  ;;  %1619 = vmatpush.msra.mxu2 %v635_v33  ;;  %v1470_v48 = vsel %vm1463_vm1, %v2929_v63, %v2930_v46  ;;  %v2944_v43 = vunpack.i.l.bf16 %v2943_v55  ;;  %v1350_v33 = vsel %vm1344_vm2, %v5050_v1, %v2934_v22  ;;  %v2949_v44 = vunpack.i.l.bf16 %v2948_v60 }
 0x26d   : > { %1639 = vmatpush.msra.mxu3 %v3605_v57  ;;  %1600 = vmatpush.msra.mxu1 %v523_v7  ;;  %v5049_v57 = vunpack.i.h.bf16 %v4094_v3  ;;  %v1351_v7 = vsel %vm1344_vm2, %v2934_v22, %v2935_v52 }
 0x26e   : > { %1620 = vmatpush.msra.mxu2 %v524_v13  ;;  %2746 = vmatmul.msk.f32.vlgmr.msra.gmra.mxu1 %vm1561_vm5, %v4088_v56  ;;  %v1352_v13 = vsel %vm1344_vm2, %v2935_v52, %v4148_v11  ;;  %v1113_v11 = vsel %vm1107_vm3, %v2915_v19, %v2944_v43  ;;  %v1114_v22 = vsel %vm1107_vm3, %v2944_v43, %v2945_v24 }
 0x26f   : > { %1640 = vmatpush.msra.mxu3 %v525_v49  ;;  %2747 = vmatmul.msk.f32.vlgmr.msra.gmra.mxu2 %vm1561_vm5, %v4088_v56  ;;  %v1469_v39 = vsel %vm1463_vm1, %v5049_v57, %v2929_v63  ;;  %v2950_v63 = vunpack.i.h.bf16 %v2948_v60  ;;  %v5053_v60 = vunpack.i.l.bf16 %v3652_v5 }
 0x270   : > { %2748 = vmatmul.msk.f32.vlgmr.msra.gmra.mxu3 %vm1561_vm5, %v4088_v56  ;;  %1672 = vmatpush.msrb.mxu1 %v1469_v39 }
 0x271   : > { %1692 = vmatpush.msrb.mxu2 %v1470_v48  ;;  %1712 = vmatpush.msrb.mxu3 %v1471_v47  ;;  %v2938_v3 = vpop.permute.xlu0 %2937  ;;  %v995_v52 = vsel %vm988_vm4, %v2949_v44, %v2950_v63  ;;  %v4964_v48 = vperm.slane %v4267_v62, 0  ;;  %v4273_v47 = vld [vmem:[%s4874_s2 + $0x30] sm:$0xff] }
 0x272   : > { %1673 = vmatpush.msrb.mxu1 %v1350_v33  ;;  %v2940_v49 = vunpack.i.h.bf16 %v2938_v3  ;;  %v2939_v57 = vunpack.i.l.bf16 %v2938_v3  ;;  %v987_v43 = vpop.permute.xlu2 %986  ;;  %v511_v33 = vld [vmem:[#allocation2 + $0x28] sm:$0xff]  ;;  %v512_v3 = vld [vmem:[#allocation2 + $0x30] sm:$0xff] }
 0x273   : > { %1693 = vmatpush.msrb.mxu2 %v1351_v7  ;;  %1713 = vmatpush.msrb.mxu3 %v1352_v13  ;;  %v996_v7 = vsel %vm988_vm4, %v2950_v63, %v987_v43  ;;  %v5056_v13 = vunpack.i.h.bf16 %v3695_v14  ;;  %v513_v63 = vld [vmem:[#allocation2 + $0x38] sm:$0xff] }
 0x274   : > { %v1231_v46 = vsel %vm1173_vm14, %v2905_v6, %v2939_v57  ;;  %v1232_v40 = vsel %vm1173_vm14, %v2939_v57, %v2940_v49  ;;  %v1233_v55 = vsel %vm1173_vm14, %v2940_v49, %v4166_v2  ;;  %v994_v6 = vsel %vm988_vm4, %v5051_v9, %v2949_v44 }
 0x275   : > { %1674 = vmatpush.msrb.mxu1 %v1231_v46  ;;  %1694 = vmatpush.msrb.mxu2 %v1232_v40  ;;  %v5052_v2 = vunpack.i.h.bf16 %v3652_v5  ;;  %v4973_v5 = vperm.slane %v4273_v47, 0  ;;  %v5057_v49 = vunpack.i.l.bf16 %v3695_v14 }
 0x276   : > { %1714 = vmatpush.msrb.mxu3 %v1233_v55 }
 0x277   : > { %1675 = vmatpush.msrb.mxu1 %v1113_v11  ;;  %1695 = vmatpush.msrb.mxu2 %v1114_v22  ;;  %v877_v58 = vsel %vm870_vm11, %v5053_v60, %v5052_v2  ;;  %v639_v57 = vsel %vm632_vm9, %v5057_v49, %v5056_v13  ;;  %v528_v44 = vmul.f32 %v4973_v5, %v512_v3 }
 0x279   : > { %v1106_v39 = vpop.permute.xlu0 %1105  ;;  %1676 = vmatpush.msrb.mxu1 %v994_v6  ;;  %1696 = vmatpush.msrb.mxu2 %v995_v52 }
 0x27a   : > { %v1115_v19 = vsel %vm1107_vm3, %v2945_v24, %v1106_v39  ;;  %v5054_v24 = vunpack.i.h.bf16 %v3636_v23 }
 0x27b   : > { %1677 = vmatpush.msrb.mxu1 %v3677_v38  ;;  %1697 = vmatpush.msrb.mxu2 %v877_v58  ;;  %v5055_v38 = vunpack.i.l.bf16 %v3636_v23  ;;  %v527_v23 = vmul.f32 %v4964_v48, %v511_v33 }
 0x27c   : > { %1715 = vmatpush.msrb.mxu3 %v1115_v19 }
 0x27d   : > { %v758_v1 = vsel %vm751_vm10, %v5055_v38, %v5054_v24  ;;  %1678 = vmatpush.msrb.mxu1 %v3737_v17  ;;  %v4297_v17 = vld [vmem:[%s4874_s2 + $0x38] sm:$0xff] }
 0x27e   : > { %1698 = vmatpush.msrb.mxu2 %v758_v1  ;;  %1716 = vmatpush.msrb.mxu3 %v996_v7  ;;  %v4971_v14 = vperm.slane %v4297_v17, 0 }
 0x27f   : > { %1679 = vmatpush.msrb.mxu1 %v3708_v29 }
 0x280   : > { %1699 = vmatpush.msrb.mxu2 %v639_v57  ;;  %1717 = vmatpush.msrb.mxu3 %v3660_v0  ;;  %v529_v29 = vmul.f32 %v4971_v14, %v513_v63 }
 0x281   : > { %1680 = vmatpush.msrb.mxu1 %v527_v23 }
 0x282   : > { %1700 = vmatpush.msrb.mxu2 %v528_v44  ;;  %1718 = vmatpush.msrb.mxu3 %v3645_v36 }
 0x283   : > { %2750 = vmatmul.msk.f32.vlgmr.msrb.gmra.mxu1 %vm1561_vm5, %v4088_v56  ;;  %2751 = vmatmul.msk.f32.vlgmr.msrb.gmra.mxu2 %vm1561_vm5, %v4088_v56 }
 0x284   : > { %1719 = vmatpush.msrb.mxu3 %v3714_v53 }
 0x286   : > { %1720 = vmatpush.msrb.mxu3 %v529_v29 }
 0x287   : > { %2752 = vmatmul.msk.f32.vlgmr.msrb.gmra.mxu3 %vm1561_vm5, %v4088_v56 }
 0x291   : > { %v1729_v0 = vpop.permute.xlu0 %1728  ;;  %v1743_v40 = vpop.permute.xlu1 %1742 }
 0x2bd   : > { %v1582_v46 = vpop.f32.mrf.mxu0 }
 0x2be   : > { %v1731_v55 = vmul.f32 %v1729_v0, %v1582_v46 }
 0x2c0   : > { %v1745_v36 = vadd.f32 %v1743_v40, %v1731_v55 }
 0x2c2   : > { %v1753_v11 = vmax.f32 %v1745_v36, 0.0 }
 0x2c4   : > { %1769 = vrot.lane.b32.xlu1 %v1753_v11, %s3137_s18 }
 0x2e9   : > { %v1662_v22 = vpop.f32.mrf.mxu0 }
 0x2ea   : > { %v1735_v9 = vmul.f32 %v1729_v0, %v1662_v22 }
 0x2eb   : > { %v1602_v52 = vpop.f32.mrf.mxu1 }
 0x2ec   : > { %v1749_v6 = vadd.f32 %v1743_v40, %v1735_v9  ;;  %v1732_v39 = vmul.f32 %v1729_v0, %v1602_v52  ;;  %v5058_v52 = vld [vmem:[#allocation4_spill] sm:$0xff] }
 0x2ee   : > { %v1757_v53 = vmax.f32 %v1749_v6, 0.0  ;;  %v1746_v2 = vadd.f32 %v1743_v40, %v1732_v39 }
 0x2f0   : > { %1777 = vrot.lane.b32.xlu0 %v1757_v53, %s3137_s18  ;;  %v1754_v60 = vmax.f32 %v1746_v2, 0.0 }
 0x2f2   : > { %v1622_v58 = vpop.f32.mrf.mxu2  ;;  %1771 = vrot.lane.b32.xlu2 %v1754_v60, %s3137_s18 }
 0x2f3   : > { %v1733_v56 = vmul.f32 %v1729_v0, %v1622_v58  ;;  %v1642_v19 = vpop.f32.mrf.mxu3 }
 0x2f4   : > { %v1734_v43 = vmul.f32 %v1729_v0, %v1642_v19 }
 0x2f5   : > { %v1747_v24 = vadd.f32 %v1743_v40, %v1733_v56 }
 0x2f6   : > { %v1748_v38 = vadd.f32 %v1743_v40, %v1734_v43 }
 0x2f7   : > { %v1755_v1 = vmax.f32 %v1747_v24, 0.0 }
 0x2f8   : > { %v1756_v33 = vmax.f32 %v1748_v38, 0.0 }
 0x2f9   : > { %1773 = vrot.lane.b32.xlu1 %v1755_v1, %s3137_s18 }
 0x2fa   : > { %1775 = vrot.lane.b32.xlu2 %v1756_v33, %s3137_s18  ;;  %v5060_v33 = vld [vmem:[#allocation47_spill] sm:$0xff] }
 0x300   : > { %v1682_v3 = vpop.f32.mrf.mxu1 }
 0x301   : > { %v1736_v7 = vmul.f32 %v1729_v0, %v1682_v3 }
 0x303   : > { %v1750_v13 = vadd.f32 %v1743_v40, %v1736_v7  ;;  %v5061_v7 = vld [vmem:[#allocation6_spill] sm:$0xff] }
 0x305   : > { %v1758_v49 = vmax.f32 %v1750_v13, 0.0 }
 0x306   : > { %v1702_v57 = vpop.f32.mrf.mxu2 }
 0x307   : > { %1779 = vrot.lane.b32.xlu2 %v1758_v49, %s3137_s18  ;;  %v1737_v23 = vmul.f32 %v1729_v0, %v1702_v57  ;;  %v5062_v49 = vld [vmem:[#allocation7_spill] sm:$0xff] }
 0x309   : > { %v1751_v44 = vadd.f32 %v1743_v40, %v1737_v23  ;;  %v5063_v23 = vld [vmem:[#allocation41_spill] sm:$0xff] }
 0x30a   : > { %v1722_v63 = vpop.f32.mrf.mxu3 }
 0x30b   : > { %v1759_v29 = vmax.f32 %v1751_v44, 0.0  ;;  %v1738_v46 = vmul.f32 %v1729_v0, %v1722_v63  ;;  %v5064_v63 = vld [vmem:[#allocation42_spill] sm:$0xff] }
 0x30d   : > { %v1752_v55 = vadd.f32 %v1743_v40, %v1738_v46  ;;  %1781 = vrot.lane.b32.xlu0 %v1759_v29, %s3137_s18  ;;  %v5059_v40 = vld [vmem:[#allocation20_spill] sm:$0xff] }
 0x30f   : > { %v1760_v36 = vmax.f32 %v1752_v55, 0.0 }
 0x311   : > { %1783 = vrot.lane.b32.xlu1 %v1760_v36, %s3137_s18  ;;  %v5065_v36 = vld [vmem:[#allocation30_spill] sm:$0xff] }
 0x336   : > { %v1770_v11 = vpop.permute.xlu1 %1769 }
 0x337   : > { %1802 = vst.msk [vmem:[#allocation2] sm:$0xff] %vm1801_vm6, %v1770_v11 }
 0x33e   : > { %v4318_v22 = vld [vmem:[#allocation2] sm:$0xff] }
 0x33f   : > { %v1844_v0 = vmul.f32 %v4318_v22, %v5058_v52 }
 0x34c   : > { %v1772_v9 = vpop.permute.xlu2 %1771 }
 0x34d   : > { %v4321_v6 = vsel %vm369_vm0, %v1770_v11, %v1772_v9 }
 0x34e   : > { %1803 = vst [vmem:[#allocation2 + $0x8] sm:$0xff] %v4321_v6  ;;  %v1845_v53 = vmul.f32 %v4321_v6, %v5059_v40 }
 0x350   : > { %v2953_v39 = vpack.i.bf16 %v1845_v53, %v1844_v0  ;;  %v5067_v0 = vld [vmem:[#allocation43_spill] sm:$0xff]  ;;  %v5068_v53 = vld [vmem:[#allocation44_spill] sm:$0xff] }
 0x352   : > { %2954 = vrot.lane.b32.xlu2 %v2953_v39, %s3142_s20 }
 0x354   : > { %v1776_v2 = vpop.permute.xlu2 %1775 }
 0x361   : > { %v1780_v60 = vpop.permute.xlu2 %1779 }
 0x362   : > { %v1778_v58 = vpop.permute.xlu0 %1777 }
 0x363   : > { %v4330_v56 = vsel %vm369_vm0, %v1776_v2, %v1778_v58  ;;  %v4333_v19 = vsel %vm369_vm0, %v1778_v58, %v1780_v60 }
 0x364   : > { %1806 = vst [vmem:[#allocation2 + $0x20] sm:$0xff] %v4330_v56 }
 0x365   : > { %1807 = vst [vmem:[#allocation2 + $0x28] sm:$0xff] %v4333_v19 }
 0x36b   : > { %v1774_v43 = vpop.permute.xlu1 %1773 }
 0x36c   : > { %v4338_v24 = vsel %vm369_vm0, %v1772_v9, %v1774_v43  ;;  %v4341_v38 = vsel %vm369_vm0, %v1774_v43, %v1776_v2  ;;  %v5066_v9 = vld [vmem:[#allocation29_spill] sm:$0xff] }
 0x36d   : > { %1804 = vst [vmem:[#allocation2 + $0x10] sm:$0xff] %v4338_v24  ;;  %v2191_v1 = vmul.f32 %v4338_v24, %v3854_v28  ;;  %v2192_v3 = vmul.f32 %v4341_v38, %v5060_v33  ;;  %v1846_v13 = vmul.f32 %v4338_v24, %v5061_v7  ;;  %v1847_v57 = vmul.f32 %v4341_v38, %v5062_v49  ;;  %v5069_v7 = vld [vmem:[#allocation16_spill] sm:$0xff]  ;;  %v5070_v49 = vld [vmem:[#allocation17_spill] sm:$0xff] }
 0x36e   : > { %1805 = vst [vmem:[#allocation2 + $0x18] sm:$0xff] %v4341_v38  ;;  %v2329_v44 = vmul.f32 %v4338_v24, %v5063_v23  ;;  %v2330_v29 = vmul.f32 %v4341_v38, %v5064_v63  ;;  %v1984_v11 = vmul.f32 %v4338_v24, %v5065_v36  ;;  %v1985_v52 = vmul.f32 %v4341_v38, %v5066_v9  ;;  %v5071_v23 = vld [vmem:[#allocation34_spill] sm:$0xff] }
 0x36f   : > { %v2973_v46 = vpack.i.bf16 %v2192_v3, %v2191_v1  ;;  %v2958_v55 = vpack.i.bf16 %v1847_v57, %v1846_v13  ;;  %v2260_v40 = vmul.f32 %v4338_v24, %v5067_v0  ;;  %v2261_v39 = vmul.f32 %v4341_v38, %v5068_v53 }
 0x370   : > { %v2963_v28 = vpack.i.bf16 %v2330_v29, %v2329_v44  ;;  %v2122_v2 = vmul.f32 %v4338_v24, %v3874_v31  ;;  %v2123_v58 = vmul.f32 %v4341_v38, %v3877_v25  ;;  %v2988_v43 = vpack.i.bf16 %v1985_v52, %v1984_v11  ;;  %v5074_v52 = vld [vmem:[#allocation13_spill] sm:$0xff] }
 0x371   : > { %2974 = vrot.lane.b32.xlu2 %v2973_v46, %s3148_s15  ;;  %2959 = vrot.lane.b32.xlu0 %v2958_v55, %s3142_s20  ;;  %v2968_v1 = vpack.i.bf16 %v2261_v39, %v2260_v40  ;;  %v2331_v3 = vmul.f32 %v4330_v56, %v3889_v20  ;;  %v1915_v13 = vmul.f32 %v4338_v24, %v5069_v7  ;;  %v5075_v40 = vld [vmem:[#allocation38_spill] sm:$0xff]  ;;  %v5076_v39 = vld [vmem:[#allocation37_spill] sm:$0xff] }
 0x372   : > { %2964 = vrot.lane.b32.xlu1 %v2963_v28, %s3150_s25  ;;  %v2978_v33 = vpack.i.bf16 %v2123_v58, %v2122_v2  ;;  %v1916_v31 = vmul.f32 %v4341_v38, %v5070_v49  ;;  %v2053_v25 = vmul.f32 %v4338_v24, %v3967_v12  ;;  %v2054_v57 = vmul.f32 %v4341_v38, %v3774_v16  ;;  %v5072_v16 = vld [vmem:[#allocation49_spill] sm:$0xff] }
 0x373   : > { %v2327_v44 = vmul.f32 %v4318_v22, %v5071_v23  ;;  %v2124_v28 = vmul.f32 %v4330_v56, %v5072_v16  ;;  %v2193_v36 = vmul.f32 %v4330_v56, %v3940_v26  ;;  %v1849_v0 = vmul.f32 %v4333_v19, %v5074_v52 }
 0x374   : > { %v2993_v46 = vpack.i.bf16 %v1916_v31, %v1915_v13  ;;  %v2983_v55 = vpack.i.bf16 %v2054_v57, %v2053_v25  ;;  %v2120_v53 = vmul.f32 %v4318_v22, %v5075_v40  ;;  %v2189_v2 = vmul.f32 %v4318_v22, %v5076_v39  ;;  %v5078_v13 = vld [vmem:[#allocation31_spill] sm:$0xff] }
 0x375   : > { %v3003_v29 = vpack.i.bf16 %v2327_v44, %v2331_v3  ;;  %v2262_v7 = vmul.f32 %v4330_v56, %v3905_v45  ;;  %v2051_v49 = vmul.f32 %v4318_v22, %v5078_v13  ;;  %v5079_v31 = vld [vmem:[#allocation15_spill] sm:$0xff] }
 0x376   : > { %v3018_v26 = vpack.i.bf16 %v2120_v53, %v2124_v28  ;;  %v3013_v58 = vpack.i.bf16 %v2189_v2, %v2193_v36  ;;  %v1982_v25 = vmul.f32 %v4318_v22, %v5079_v31  ;;  %v5080_v57 = vld [vmem:[#allocation39_spill] sm:$0xff]  ;;  %v5084_v28 = vld [vmem:[#allocation8_spill] sm:$0xff] }
 0x377   : > { %v2258_v23 = vmul.f32 %v4318_v22, %v5080_v57  ;;  %v1913_v36 = vmul.f32 %v4318_v22, %v5084_v28  ;;  %v5095_v28 = vld [vmem:[#allocation53_spill] sm:$0xff] }
 0x379   : > { %2989 = vrot.lane.b32.xlu2 %v2988_v43, %s3144_s22  ;;  %2969 = vrot.lane.b32.xlu0 %v2968_v1, %s3151_s26  ;;  %v2055_v1 = vmul.f32 %v4330_v56, %v3692_v30  ;;  %v5081_v30 = vld [vmem:[#allocation23_spill] sm:$0xff] }
 0x37a   : > { %2979 = vrot.lane.b32.xlu1 %v2978_v33, %s3152_s12  ;;  %v5077_v33 = vld [vmem:[#allocation21_spill] sm:$0xff] }
 0x37b   : > { %v1986_v3 = vmul.f32 %v4330_v56, %v5077_v33  ;;  %v3023_v44 = vpack.i.bf16 %v2051_v49, %v2055_v1  ;;  %v5087_v1 = vld [vmem:[#allocation5_spill] sm:$0xff]  ;;  %v5089_v49 = vld [vmem:[#allocation35_spill] sm:$0xff] }
 0x37c   : > { %v2328_v31 = vmul.f32 %v4321_v6, %v5089_v49 }
 0x37f   : > { %v1782_v63 = vpop.permute.xlu0 %1781 }
 0x380   : > { %v4388_v20 = vsel %vm369_vm0, %v1780_v60, %v1782_v63  ;;  %v5073_v60 = vld [vmem:[#allocation14_spill] sm:$0xff] }
 0x381   : > { %1808 = vst [vmem:[#allocation2 + $0x30] sm:$0xff] %v4388_v20  ;;  %3004 = vrot.lane.b32.xlu2 %v3003_v29, %s3150_s25  ;;  %2994 = vrot.lane.b32.xlu0 %v2993_v46, %s3143_s21  ;;  %v1848_v9 = vmul.f32 %v4330_v56, %v5073_v60  ;;  %v3008_v29 = vpack.i.bf16 %v2258_v23, %v2262_v7  ;;  %v5082_v46 = vld [vmem:[#allocation27_spill] sm:$0xff] }
 0x382   : > { %2984 = vrot.lane.b32.xlu1 %v2983_v55, %s3147_s14  ;;  %v1917_v55 = vmul.f32 %v4330_v56, %v5082_v46  ;;  %v2332_v60 = vmul.f32 %v4333_v19, %v3895_v8  ;;  %v2263_v8 = vmul.f32 %v4333_v19, %v3909_v41  ;;  %v5093_v46 = vld [vmem:[#allocation25_spill] sm:$0xff] }
 0x383   : > { %v1784_v12 = vpop.permute.xlu1 %1783  ;;  %v2998_v43 = vpack.i.bf16 %v1849_v0, %v1848_v9 }
 0x384   : > { %v4399_v11 = vsel %vm369_vm0, %v1782_v63, %v1784_v12  ;;  %1810 = vst.msk [vmem:[#allocation2 + $0x40] sm:$0xff] %vm369_vm0, %v1784_v12  ;;  %v3028_v63 = vpack.i.bf16 %v1982_v25, %v1986_v3  ;;  %v5083_v12 = vld [vmem:[#allocation24_spill] sm:$0xff]  ;;  %v3033_v52 = vpack.i.bf16 %v1913_v36, %v1917_v55  ;;  %v1988_v55 = vmul.f32 %v4388_v20, %v5093_v46 }
 0x385   : > { %1809 = vst [vmem:[#allocation2 + $0x38] sm:$0xff] %v4399_v11  ;;  %v1851_v45 = vmul.f32 %v4399_v11, %v5081_v30  ;;  %v1850_v16 = vmul.f32 %v4388_v20, %v5083_v12  ;;  %v2265_v39 = vmul.f32 %v4399_v11, %v3952_v54  ;;  %v2334_v2 = vmul.f32 %v4399_v11, %v3924_v35  ;;  %v5085_v54 = vld [vmem:[#allocation46_spill] sm:$0xff]  ;;  %v5090_v25 = vld [vmem:[#allocation32_spill] sm:$0xff] }
 0x386   : > { %v2121_v35 = vmul.f32 %v4321_v6, %v5085_v54  ;;  %v2052_v57 = vmul.f32 %v4321_v6, %v5090_v25  ;;  %v5092_v30 = vld [vmem:[#allocation52_spill] sm:$0xff]  ;;  %v2127_v36 = vmul.f32 %v4399_v11, %v5095_v28  ;;  %v5101_v54 = vld [vmem:[#allocation55_spill] sm:$0xff] }
 0x387   : > { %v3038_v9 = vpack.i.bf16 %v1851_v45, %v1850_v16  ;;  %v5094_v12 = vld [vmem:[#allocation40_spill] sm:$0xff] }
 0x388   : > { %v2259_v16 = vmul.f32 %v4321_v6, %v5094_v12  ;;  %v5109_v46 = vld [vmem:[#allocation28_spill] sm:$0xff]  ;;  %v5110_v12 = vld [vmem:[#allocation18_spill] sm:$0xff] }
 0x389   : > { %3019 = vrot.lane.b32.xlu2 %v3018_v26, %s3152_s12  ;;  %3014 = vrot.lane.b32.xlu0 %v3013_v58, %s3148_s15 }
 0x38a   : > { %2999 = vrot.lane.b32.xlu1 %v2998_v43, %s3142_s20  ;;  %v5086_v43 = vld [vmem:[#allocation45_spill] sm:$0xff] }
 0x38b   : > { %v2326_v0 = vld [vmem:[#allocation2 + $0x40] sm:$0xff]  ;;  %v2190_v41 = vmul.f32 %v4321_v6, %v5086_v43  ;;  %v5102_v43 = vld [vmem:[#allocation9_spill] sm:$0xff] }
 0x38c   : > { %v2266_v40 = vmul.f32 %v2326_v0, %v3948_v42  ;;  %v2335_v53 = vmul.f32 %v2326_v0, %v3920_v34  ;;  %v2126_v34 = vmul.f32 %v4388_v20, %v3970_v15  ;;  %v2195_v42 = vmul.f32 %v4388_v20, %v4015_v10  ;;  %v5088_v15 = vld [vmem:[#allocation50_spill] sm:$0xff] }
 0x38d   : > { %v1852_v33 = vmul.f32 %v2326_v0, %v5087_v1  ;;  %v2333_v13 = vmul.f32 %v4388_v20, %v5088_v15  ;;  %v2057_v10 = vmul.f32 %v4388_v20, %v3783_v32  ;;  %v2264_v32 = vmul.f32 %v4388_v20, %v5092_v30  ;;  %v5103_v15 = vld [vmem:[#allocation19_spill] sm:$0xff] }
 0x38e   : > { %v3063_v26 = vpack.i.bf16 %v2266_v40, %v2265_v39  ;;  %v3053_v58 = vpack.i.bf16 %v2335_v53, %v2334_v2  ;;  %v3068_v3 = vpack.i.bf16 %v2126_v34, %v2121_v35  ;;  %v3058_v7 = vpack.i.bf16 %v2195_v42, %v2190_v41  ;;  %v5098_v2 = vld [vmem:[#allocation33_spill] sm:$0xff]  ;;  %v5100_v34 = vld [vmem:[#allocation56_spill] sm:$0xff] }
 0x38f   : > { %v3043_v23 = vpack.i.bf16 %v2333_v13, %v2328_v31  ;;  %v2128_v45 = vmul.f32 %v2326_v0, %v3960_v59  ;;  %v5097_v59 = vld [vmem:[#allocation54_spill] sm:$0xff]  ;;  %v2196_v42 = vmul.f32 %v4399_v11, %v5100_v34  ;;  %v2058_v35 = vmul.f32 %v4399_v11, %v5101_v54 }
 0x390   : > { %v2197_v39 = vmul.f32 %v2326_v0, %v5097_v59  ;;  %v1914_v41 = vmul.f32 %v4321_v6, %v5102_v43  ;;  %v1990_v13 = vmul.f32 %v2326_v0, %v5103_v15  ;;  %v5105_v31 = vld [vmem:[#allocation26_spill] sm:$0xff] }
 0x391   : > { %3024 = vrot.lane.b32.xlu2 %v3023_v44, %s3147_s14  ;;  %3029 = vrot.lane.b32.xlu0 %v3028_v63, %s3144_s22  ;;  %v5091_v44 = vld [vmem:[#allocation48_spill] sm:$0xff]  ;;  %v3083_v40 = vpack.i.bf16 %v2128_v45, %v2127_v36  ;;  %v1989_v25 = vmul.f32 %v4399_v11, %v5105_v31  ;;  %v2623_v36 = vld [vmem:[%s4879_s7] sm:$0xff] }
 0x392   : > { %3009 = vrot.lane.b32.xlu1 %v3008_v29, %s3151_s26  ;;  %v2125_v63 = vmul.f32 %v4333_v19, %v5091_v44  ;;  %v3078_v29 = vpack.i.bf16 %v2057_v10, %v2052_v57  ;;  %v3073_v1 = vpack.i.bf16 %v2197_v39, %v2196_v42  ;;  %v5104_v10 = vld [vmem:[#allocation11_spill] sm:$0xff]  ;;  %v5106_v57 = vld [vmem:[#allocation12_spill] sm:$0xff] }
 0x393   : > { %v1921_v49 = vmul.f32 %v2326_v0, %v5104_v10  ;;  %v5107_v44 = vld [vmem:[#allocation51_spill] sm:$0xff] }
 0x399   : > { %2355 = vrot.lane.b32.xlu0 %v2332_v60, %s3150_s25  ;;  %3039 = vrot.lane.b32.xlu2 %v3038_v9, %s3142_s20  ;;  %v5096_v60 = vld [vmem:[#allocation22_spill] sm:$0xff] }
 0x39a   : > { %3034 = vrot.lane.b32.xlu1 %v3033_v52, %s3143_s21  ;;  %v1983_v9 = vmul.f32 %v4321_v6, %v5096_v60  ;;  %v3048_v52 = vpack.i.bf16 %v2264_v32, %v2259_v16  ;;  %v1987_v16 = vmul.f32 %v4333_v19, %v5110_v12  ;;  %v2637_v60 = vld [vmem:[%s4880_s8] sm:$0xff] }
 0x39c   : > { %v3088_v53 = vpack.i.bf16 %v1988_v55, %v1983_v9  ;;  %v1918_v55 = vmul.f32 %v4333_v19, %v5109_v46 }
 0x3a1   : > { %2286 = vrot.lane.b32.xlu0 %v2263_v8, %s3151_s26  ;;  %3064 = vrot.lane.b32.xlu2 %v3063_v26, %s3151_s26  ;;  %v2059_v8 = vmul.f32 %v2326_v0, %v5098_v2  ;;  %v5099_v26 = vld [vmem:[#allocation10_spill] sm:$0xff]  ;;  %v5108_v0 = vld [vmem:[#allocation36_spill] sm:$0xff] }
 0x3a2   : > { %3054 = vrot.lane.b32.xlu1 %v3053_v58, %s3150_s25  ;;  %v1919_v58 = vmul.f32 %v4388_v20, %v5099_v26  ;;  %v2056_v45 = vmul.f32 %v4333_v19, %v5108_v0 }
 0x3a9   : > { %1878 = vrot.lane.b32.xlu0 %v1852_v33, %s3142_s20  ;;  %3069 = vrot.lane.b32.xlu2 %v3068_v3, %s3152_s12  ;;  %v3093_v33 = vpack.i.bf16 %v2059_v8, %v2058_v35  ;;  %v3098_v3 = vpack.i.bf16 %v1919_v58, %v1914_v41 }
 0x3aa   : > { %3059 = vrot.lane.b32.xlu1 %v3058_v7, %s3148_s15 }
 0x3ac   : > { %v4505_v7 = vpop.permute.xlu2 %2954 }
 0x3b1   : > { %3044 = vrot.lane.b32.xlu0 %v3043_v23, %s3150_s25  ;;  %2148 = vrot.lane.b32.xlu2 %v2125_v63, %s3152_s12  ;;  %v1920_v23 = vmul.f32 %v4399_v11, %v5106_v57  ;;  %v2194_v63 = vmul.f32 %v4333_v19, %v5107_v44 }
 0x3b2   : > { %3079 = vrot.lane.b32.xlu1 %v3078_v29, %s3147_s14  ;;  %v3103_v29 = vpack.i.bf16 %v1990_v13, %v1989_v25 }
 0x3b3   : > { %v3108_v30 = vpack.i.bf16 %v1921_v49, %v1920_v23 }
 0x3b9   : > { %3049 = vrot.lane.b32.xlu0 %v3048_v52, %s3151_s26  ;;  %3084 = vrot.lane.b32.xlu2 %v3083_v40, %s3152_s12 }
 0x3ba   : > { %3089 = vrot.lane.b32.xlu1 %v3088_v53, %s3144_s22 }
 0x3c1   : > { %3074 = vrot.lane.b32.xlu0 %v3073_v1, %s3148_s15  ;;  %3094 = vrot.lane.b32.xlu2 %v3093_v33, %s3147_s14 }
 0x3c2   : > { %3099 = vrot.lane.b32.xlu1 %v3098_v3, %s3143_s21 }
 0x3c9   : > { %2217 = vrot.lane.b32.xlu0 %v2194_v63, %s3148_s15  ;;  %3104 = vrot.lane.b32.xlu2 %v3103_v29, %s3144_s22 }
 0x3ca   : > { %3109 = vrot.lane.b32.xlu1 %v3108_v30, %s3143_s21 }
 0x3cb   : > { %v4518_v32 = vpop.permute.xlu2 %2974 }
 0x3cc   : > { %v2977_v34 = vunpack.i.h.bf16 %v4518_v32  ;;  %v2976_v42 = vunpack.i.l.bf16 %v4518_v32 }
 0x3ce   : > { %v2227_v15 = vsel %vm1173_vm14, %v2976_v42, %v2977_v34 }
 0x3d1   : > { %2079 = vrot.lane.b32.xlu0 %v2056_v45, %s3147_s14  ;;  %1941 = vrot.lane.b32.xlu2 %v1918_v55, %s3143_s21  ;;  %s2765_s14 = sshll.u32 %s5125_s10, 6 }
 0x3d2   : > { %2010 = vrot.lane.b32.xlu1 %v1987_v16, %s3144_s22  ;;  %s4859_s17 = scalar_lea.vmem %s4881_s9, %s2765_s14 }
 0x3d3   : > { %v4529_v28 = vpop.permute.xlu2 %2989 }
 0x3d4   : > { %v2992_v31 = vunpack.i.h.bf16 %v4529_v28  ;;  %v2991_v25 = vunpack.i.l.bf16 %v4529_v28 }
 0x3d6   : > { %v2020_v46 = vsel %vm870_vm11, %v2991_v25, %v2992_v31 }
 0x3d9   : > { %2626 = vperm.xlu0 %2951, %v2623_v36  }
 0x3da   : > { %2640 = vperm.xlu1 %2952, %v2637_v60   ;;  %v1821_v60 = vmul.f32 %v4338_v24, %v516_v37 }
 0x3db   : > { %v4537_v9 = vpop.permute.xlu2 %3004 }
 0x3dc   : > { %v3006_v53 = vunpack.i.l.bf16 %v4537_v9 }
 0x3e3   : > { %v4539_v52 = vpop.permute.xlu0 %2959  ;;  %v4544_v59 = vpop.permute.xlu2 %3019 }
 0x3e4   : > { %v4541_v40 = vpop.permute.xlu1 %2964  ;;  %v2962_v30 = vunpack.i.h.bf16 %v4539_v52  ;;  %v2961_v0 = vunpack.i.l.bf16 %v4539_v52  ;;  %v4970_v24 = vunpack.i.l.bf16 %v4544_v59 }
 0x3e5   : > { %v2967_v39 = vunpack.i.h.bf16 %v4541_v40  ;;  %v2966_v2 = vunpack.i.l.bf16 %v4541_v40 }
 0x3e6   : > { %v1882_v36 = vsel %vm632_vm9, %v2961_v0, %v2962_v30 }
 0x3e7   : > { %v2365_v8 = vsel %vm1463_vm1, %v2966_v2, %v2967_v39  ;;  %v2366_v26 = vsel %vm1463_vm1, %v2967_v39, %v3006_v53  ;;  %v4611_v39 = vld [vmem:[%s4878_s6] sm:$0xff] }
 0x3e8   : > { %2510 = vmatpush.msra.mxu2 %v2365_v8  ;;  %2530 = vmatpush.msra.mxu3 %v2366_v26 }
 0x3eb   : > { %v4554_v58 = vpop.permute.xlu0 %2969  ;;  %v4567_v3 = vpop.permute.xlu2 %3024 }
 0x3ec   : > { %v2972_v54 = vunpack.i.h.bf16 %v4554_v58  ;;  %v2971_v35 = vunpack.i.l.bf16 %v4554_v58  ;;  %v4560_v43 = vpop.permute.xlu1 %2979  ;;  %v3027_v58 = vunpack.i.h.bf16 %v4567_v3 }
 0x3ed   : > { %v2982_v41 = vunpack.i.h.bf16 %v4560_v43  ;;  %v2981_v1 = vunpack.i.l.bf16 %v4560_v43 }
 0x3ee   : > { %v2296_v33 = vsel %vm1344_vm2, %v2971_v35, %v2972_v54 }
 0x3ef   : > { %2511 = vmatpush.msra.mxu2 %v2296_v33  ;;  %v2158_v13 = vsel %vm1107_vm3, %v2981_v1, %v2982_v41 }
 0x3f1   : > { %2512 = vmatpush.msra.mxu2 %v2227_v15 }
 0x3f3   : > { %v4575_v10 = vpop.permute.xlu0 %2994  ;;  %2513 = vmatpush.msra.mxu2 %v2158_v13  ;;  %v4590_v45 = vpop.permute.xlu2 %3039 }
 0x3f4   : > { %v4577_v49 = vpop.permute.xlu1 %2984  ;;  %v2997_v44 = vunpack.i.h.bf16 %v4575_v10  ;;  %v2996_v63 = vunpack.i.l.bf16 %v4575_v10 }
 0x3f5   : > { %v2987_v57 = vunpack.i.h.bf16 %v4577_v49  ;;  %v2986_v23 = vunpack.i.l.bf16 %v4577_v49 }
 0x3f6   : > { %v1951_v12 = vsel %vm751_vm10, %v2996_v63, %v2997_v44 }
 0x3f7   : > { %v2089_v29 = vsel %vm988_vm4, %v2986_v23, %v2987_v57 }
 0x3f8   : > { %2514 = vmatpush.msra.mxu2 %v2089_v29  ;;  %v4967_v29 = vunpack.i.l.bf16 %v4567_v3 }
 0x3fa   : > { %2515 = vmatpush.msra.mxu2 %v2020_v46 }
 0x3fb   : > { %v4595_v55 = vpop.permute.xlu0 %3014  ;;  %v4615_v8 = vpop.permute.xlu2 %3064 }
 0x3fc   : > { %v4600_v16 = vpop.permute.xlu1 %2999  ;;  %2516 = vmatpush.msra.mxu2 %v1951_v12  ;;  %v4972_v15 = vunpack.i.l.bf16 %v4595_v55 }
 0x3fe   : > { %2517 = vmatpush.msra.mxu2 %v1882_v36  ;;  %v2228_v13 = vsel %vm1173_vm14, %v2977_v34, %v4972_v15  ;;  %v2159_v36 = vsel %vm1107_vm3, %v2982_v41, %v4970_v24  ;;  %v2090_v34 = vsel %vm988_vm4, %v2987_v57, %v4967_v29  ;;  %v3022_v15 = vunpack.i.h.bf16 %v4544_v59 }
 0x400   : > { %2518 = vmatpush.msra.mxu2 %v1821_v60 }
 0x401   : > { %2755 = vmatmul.msk.f32.vlgmr.msra.gmra.mxu2 %vm1561_vm5, %v4611_v39 }
 0x403   : > { %v4617_v26 = vpop.permute.xlu0 %3029 }
 0x404   : > { %v4619_v33 = vpop.permute.xlu1 %3009  ;;  %v4966_v46 = vunpack.i.l.bf16 %v4617_v26  ;;  %v3032_v32 = vunpack.i.h.bf16 %v4617_v26 }
 0x405   : > { %v4974_v18 = vunpack.i.l.bf16 %v4619_v33  ;;  %v3012_v24 = vunpack.i.h.bf16 %v4619_v33 }
 0x406   : > { %v2021_v48 = vsel %vm870_vm11, %v2992_v31, %v4966_v46  ;;  %v3067_v31 = vunpack.i.h.bf16 %v4615_v8 }
 0x407   : > { %v2297_v37 = vsel %vm1344_vm2, %v2972_v54, %v4974_v18  ;;  %v4639_v54 = vpop.permute.xlu2 %3069 }
 0x408   : > { %2531 = vmatpush.msra.mxu3 %v2297_v37 }
 0x40a   : > { %2532 = vmatpush.msra.mxu3 %v2228_v13  ;;  %v4968_v13 = vunpack.i.l.bf16 %v4600_v16 }
 0x40b   : > { %v4632_v12 = vpop.permute.xlu0 %2355 }
 0x40c   : > { %v4637_v60 = vpop.permute.xlu1 %3034  ;;  %2533 = vmatpush.msra.mxu3 %v2159_v36  ;;  %v1883_v51 = vsel %vm632_vm9, %v2962_v30, %v4968_v13 }
 0x40d   : > { %v4969_v37 = vunpack.i.l.bf16 %v4637_v60 }
 0x40e   : > { %2534 = vmatpush.msra.mxu3 %v2090_v34  ;;  %v1822_v34 = vmul.f32 %v4341_v38, %v517_v61 }
 0x40f   : > { %v1952_v41 = vsel %vm751_vm10, %v2997_v44, %v4969_v37  ;;  %v4662_v44 = vpop.permute.xlu2 %2148 }
 0x410   : > { %2535 = vmatpush.msra.mxu3 %v2021_v48  ;;  %v3066_v48 = vunpack.i.l.bf16 %v4615_v8 }
 0x412   : > { %2536 = vmatpush.msra.mxu3 %v1952_v41  ;;  %v3007_v41 = vunpack.i.h.bf16 %v4537_v9  ;;  %v5113_v9 = vunpack.i.l.bf16 %v4619_v33  ;;  %v5115_v33 = vunpack.i.l.bf16 %v4595_v55 }
 0x413   : > { %v4652_v36 = vpop.permute.xlu0 %2286 }
 0x414   : > { %v3055_v57 = vpop.permute.xlu1 %3054  ;;  %2537 = vmatpush.msra.mxu3 %v1883_v51  ;;  %v2301_v51 = vsel %vm1344_vm2, %v3066_v48, %v3067_v31 }
 0x415   : > { %v3057_v46 = vunpack.i.h.bf16 %v3055_v57  ;;  %v3056_v29 = vunpack.i.l.bf16 %v3055_v57 }
 0x416   : > { %2538 = vmatpush.msra.mxu3 %v1822_v34 }
 0x417   : > { %2756 = vmatmul.msk.f32.vlgmr.msra.gmra.mxu3 %vm1561_vm5, %v4611_v39  ;;  %v2370_v30 = vsel %vm1463_vm1, %v3056_v29, %v3057_v46  ;;  %v4672_v38 = vpop.permute.xlu2 %3084 }
 0x418   : > { %2610 = vmatpush.msrb.mxu3 %v2370_v30 }
 0x41a   : > { %2611 = vmatpush.msrb.mxu3 %v2301_v51 }
 0x41b   : > { %v4668_v50 = vpop.permute.xlu0 %1878 }
 0x41c   : > { %v4670_v61 = vpop.permute.xlu1 %3059 }
 0x41d   : > { %v3061_v14 = vunpack.i.l.bf16 %v4670_v61 }
 0x41f   : > { %v4688_v51 = vpop.permute.xlu2 %3094 }
 0x423   : > { %v4674_v8 = vpop.permute.xlu0 %3044 }
 0x424   : > { %v3047_v57 = vunpack.i.h.bf16 %v4674_v8  ;;  %v3046_v34 = vunpack.i.l.bf16 %v4674_v8  ;;  %v4679_v13 = vpop.permute.xlu1 %3079 }
 0x425   : > { %v3081_v5 = vunpack.i.l.bf16 %v4679_v13 }
 0x426   : > { %v2363_v46 = vsel %vm1463_vm1, %v3007_v41, %v3046_v34  ;;  %v2364_v31 = vsel %vm1463_vm1, %v3046_v34, %v2966_v2  ;;  %v2369_v30 = vsel %vm1463_vm1, %v3047_v57, %v3056_v29  ;;  %v3017_v34 = vunpack.i.h.bf16 %v4595_v55 }
 0x427   : > { %2470 = vmatpush.msra.mxu0 %v2363_v46  ;;  %2490 = vmatpush.msra.mxu1 %v2364_v31  ;;  %v3071_v29 = vunpack.i.l.bf16 %v4639_v54  ;;  %v2088_v43 = vsel %vm988_vm4, %v3081_v5, %v2986_v23  ;;  %v3072_v23 = vunpack.i.h.bf16 %v4639_v54  ;;  %v5119_v54 = vunpack.i.l.bf16 %v4617_v26 }
 0x428   : > { %2590 = vmatpush.msrb.mxu2 %v2369_v30  ;;  %v2225_v18 = vsel %vm1173_vm14, %v3017_v34, %v3061_v14  ;;  %v2956_v34 = vunpack.i.l.bf16 %v4505_v7 }
 0x429   : > { %v2161_v55 = vsel %vm1107_vm3, %v4662_v44, %v3072_v23 }
 0x42b   : > { %v4690_v37 = vpop.permute.xlu0 %3049 }
 0x42c   : > { %v3052_v41 = vunpack.i.h.bf16 %v4690_v37  ;;  %v3051_v40 = vunpack.i.l.bf16 %v4690_v37  ;;  %v4696_v2 = vpop.permute.xlu1 %3089 }
 0x42e   : > { %v2294_v46 = vsel %vm1344_vm2, %v3012_v24, %v3051_v40  ;;  %v2295_v31 = vsel %vm1344_vm2, %v3051_v40, %v2971_v35  ;;  %v2300_v30 = vsel %vm1344_vm2, %v3052_v41, %v3066_v48  ;;  %v2226_v24 = vsel %vm1173_vm14, %v3061_v14, %v2976_v42 }
 0x42f   : > { %2471 = vmatpush.msra.mxu0 %v2294_v46  ;;  %2491 = vmatpush.msra.mxu1 %v2295_v31  ;;  %v3091_v35 = vunpack.i.l.bf16 %v4696_v2  ;;  %v2156_v48 = vsel %vm1107_vm3, %v3022_v15, %v3071_v29  ;;  %v2157_v40 = vsel %vm1107_vm3, %v3071_v29, %v2981_v1  ;;  %v2957_v46 = vunpack.i.h.bf16 %v4505_v7 }
 0x430   : > { %2591 = vmatpush.msrb.mxu2 %v2300_v30  ;;  %v3062_v14 = vunpack.i.h.bf16 %v4670_v61  ;;  %v2087_v15 = vsel %vm988_vm4, %v3027_v58, %v3081_v5  ;;  %v3037_v1 = vunpack.i.h.bf16 %v4637_v60  ;;  %v3087_v7 = vunpack.i.h.bf16 %v4672_v38 }
 0x431   : > { %2472 = vmatpush.msra.mxu0 %v2225_v18  ;;  %2492 = vmatpush.msra.mxu1 %v2226_v24  ;;  %v3086_v29 = vunpack.i.l.bf16 %v4672_v38  ;;  %v3105_v24 = vpop.permute.xlu2 %3104  ;;  %v2019_v58 = vsel %vm870_vm11, %v3091_v35, %v2991_v25  ;;  %v3097_v38 = vunpack.i.h.bf16 %v4688_v51  ;;  %v1881_v10 = vsel %vm632_vm9, %v2957_v46, %v2961_v0 }
 0x432   : > { %v3106_v28 = vunpack.i.l.bf16 %v3105_v24  ;;  %v2299_v8 = vsel %vm1344_vm2, %v4652_v36, %v3052_v41 }
 0x433   : > { %v3075_v42 = vpop.permute.xlu0 %3074  ;;  %2473 = vmatpush.msra.mxu0 %v2156_v48  ;;  %2493 = vmatpush.msra.mxu1 %v2157_v40  ;;  %v2018_v40 = vsel %vm870_vm11, %v3032_v32, %v3091_v35  ;;  %v3107_v32 = vunpack.i.h.bf16 %v3105_v24 }
 0x434   : > { %v3077_v18 = vunpack.i.h.bf16 %v3075_v42  ;;  %v3076_v31 = vunpack.i.l.bf16 %v3075_v42  ;;  %v4723_v30 = vpop.permute.xlu1 %3099  ;;  %v3096_v42 = vunpack.i.l.bf16 %v4688_v51  ;;  %v2162_v51 = vsel %vm1107_vm3, %v3072_v23, %v3086_v29 }
 0x435   : > { %v3101_v48 = vunpack.i.l.bf16 %v4723_v30  ;;  %2474 = vmatpush.msra.mxu0 %v2087_v15  ;;  %2494 = vmatpush.msra.mxu1 %v2088_v43  ;;  %v3082_v15 = vunpack.i.h.bf16 %v4679_v13  ;;  %v1880_v43 = vsel %vm632_vm9, %v2956_v34, %v2957_v46  ;;  %v2025_v27 = vsel %vm870_vm11, %v3106_v28, %v3107_v32 }
 0x436   : > { %v2231_v5 = vsel %vm1173_vm14, %v3062_v14, %v3076_v31  ;;  %v2232_v49 = vsel %vm1173_vm14, %v3076_v31, %v3077_v18  ;;  %v3092_v18 = vunpack.i.h.bf16 %v4696_v2  ;;  %v2163_v31 = vsel %vm1107_vm3, %v3086_v29, %v3087_v7  ;;  %v5111_v29 = vld [vmem:[#allocation57_spill] sm:$0xff] }
 0x437   : > { %2475 = vmatpush.msra.mxu0 %v2018_v40  ;;  %2495 = vmatpush.msra.mxu1 %v2019_v58  ;;  %v1949_v25 = vsel %vm751_vm10, %v3037_v1, %v3101_v48  ;;  %v1950_v35 = vsel %vm751_vm10, %v3101_v48, %v2996_v63  ;;  %v1820_v63 = vmul.f32 %v4321_v6, %v515_v4  ;;  %v5112_v48 = vperm.slane %v5111_v29, 0 }
 0x438   : > { %2592 = vmatpush.msrb.mxu2 %v2231_v5  ;;  %2612 = vmatpush.msrb.mxu3 %v2232_v49  ;;  %v2093_v24 = vsel %vm988_vm4, %v3082_v15, %v3096_v42  ;;  %v2094_v7 = vsel %vm988_vm4, %v3096_v42, %v3097_v38  ;;  %v3102_v4 = vunpack.i.h.bf16 %v4723_v30  ;;  %v2024_v46 = vsel %vm870_vm11, %v3092_v18, %v3106_v28 }
 0x439   : > { %2476 = vmatpush.msra.mxu0 %v1949_v25  ;;  %2496 = vmatpush.msra.mxu1 %v1950_v35  ;;  %v1819_v34 = vmul.f32 %v4318_v22, %v5112_v48  ;;  %v3042_v40 = vunpack.i.h.bf16 %v4590_v45  ;;  %v3041_v58 = vunpack.i.l.bf16 %v4590_v45  ;;  %v2367_v22 = vsel %vm1463_vm1, %v3006_v53, %v4632_v12 }
 0x43a   : > { %2593 = vmatpush.msrb.mxu2 %v2162_v51  ;;  %2613 = vmatpush.msrb.mxu3 %v2163_v31  ;;  %v2368_v30 = vsel %vm1463_vm1, %v4632_v12, %v3047_v57  ;;  %v2298_v53 = vsel %vm1344_vm2, %v5113_v9, %v4652_v36  ;;  %v5114_v49 = vperm.slane %v4273_v47, 0  ;;  %v5116_v42 = vperm.slane %v4297_v17, 0 }
 0x43b   : > { %v2218_v1 = vpop.permute.xlu0 %2217  ;;  %2477 = vmatpush.msra.mxu0 %v1880_v43  ;;  %2497 = vmatpush.msra.mxu1 %v1881_v10  ;;  %v1886_v12 = vsel %vm632_vm9, %v3041_v58, %v3042_v40  ;;  %v1887_v57 = vsel %vm632_vm9, %v3042_v40, %v4668_v50  ;;  %v5117_v47 = vunpack.i.l.bf16 %v4544_v59  ;;  %v5118_v50 = vunpack.i.l.bf16 %v4567_v3  ;;  %v1942_v59 = vpop.permute.xlu2 %1941 }
 0x43c   : > { %v3110_v52 = vpop.permute.xlu1 %3109  ;;  %2594 = vmatpush.msrb.mxu2 %v2093_v24  ;;  %2614 = vmatpush.msrb.mxu3 %v2094_v7  ;;  %v1825_v38 = vmul.f32 %v4388_v20, %v5114_v49  ;;  %v2229_v37 = vsel %vm1173_vm14, %v5115_v33, %v2218_v1  ;;  %v2230_v36 = vsel %vm1173_vm14, %v2218_v1, %v3062_v14  ;;  %v3002_v3 = vunpack.i.h.bf16 %v4600_v16 }
 0x43d   : > { %v3112_v6 = vunpack.i.h.bf16 %v3110_v52  ;;  %v3111_v0 = vunpack.i.l.bf16 %v3110_v52  ;;  %2478 = vmatpush.msra.mxu0 %v1819_v34  ;;  %2498 = vmatpush.msra.mxu1 %v1820_v63  ;;  %v1826_v32 = vmul.f32 %v4399_v11, %v5116_v42  ;;  %v2160_v20 = vsel %vm1107_vm3, %v5117_v47, %v4662_v44 }
 0x43e   : > { %2595 = vmatpush.msrb.mxu2 %v2024_v46  ;;  %2615 = vmatpush.msrb.mxu3 %v2025_v27  ;;  %v5120_v14 = vunpack.i.l.bf16 %v4637_v60  ;;  %v5121_v28 = vunpack.i.l.bf16 %v4600_v16  ;;  %v1885_v25 = vsel %vm632_vm9, %v3002_v3, %v3041_v58  ;;  %v5122_v2 = vperm.slane %v4158_v21, 0 }
 0x43f   : > { %2753 = vmatmul.msk.f32.vlgmr.msra.gmra.mxu0 %vm1561_vm5, %v4611_v39  ;;  %2754 = vmatmul.msk.f32.vlgmr.msra.gmra.mxu1 %vm1561_vm5, %v4611_v39  ;;  %v1955_v45 = vsel %vm751_vm10, %v3102_v4, %v3111_v0  ;;  %v1956_v5 = vsel %vm751_vm10, %v3111_v0, %v3112_v6  ;;  %v5123_v60 = vperm.slane %v4267_v62, 0 }
 0x440   : > { %2550 = vmatpush.msrb.mxu0 %v2367_v22  ;;  %2570 = vmatpush.msrb.mxu1 %v2368_v30  ;;  %v1953_v23 = vsel %vm751_vm10, %v5120_v14, %v1942_v59  ;;  %v1884_v26 = vsel %vm632_vm9, %v5121_v28, %v3002_v3  ;;  %v1823_v35 = vmul.f32 %v4330_v56, %v5122_v2 }
 0x441   : > { %2596 = vmatpush.msrb.mxu2 %v1955_v45  ;;  %2616 = vmatpush.msrb.mxu3 %v1956_v5 }
 0x442   : > { %2551 = vmatpush.msrb.mxu0 %v2298_v53  ;;  %2571 = vmatpush.msrb.mxu1 %v2299_v8 }
 0x443   : > { %2597 = vmatpush.msrb.mxu2 %v1886_v12  ;;  %2617 = vmatpush.msrb.mxu3 %v1887_v57  ;;  %v2080_v41 = vpop.permute.xlu0 %2079 }
 0x444   : > { %2552 = vmatpush.msrb.mxu0 %v2229_v37  ;;  %2572 = vmatpush.msrb.mxu1 %v2230_v36  ;;  %v2091_v17 = vsel %vm988_vm4, %v5118_v50, %v2080_v41  ;;  %v2092_v11 = vsel %vm988_vm4, %v2080_v41, %v3082_v15  ;;  %v2011_v61 = vpop.permute.xlu1 %2010  ;;  %v1954_v15 = vsel %vm751_vm10, %v1942_v59, %v3102_v4 }
 0x445   : > { %2598 = vmatpush.msrb.mxu2 %v1825_v38  ;;  %2618 = vmatpush.msrb.mxu3 %v1826_v32  ;;  %v2022_v13 = vsel %vm870_vm11, %v5119_v54, %v2011_v61  ;;  %v2023_v44 = vsel %vm870_vm11, %v2011_v61, %v3092_v18  ;;  %v1824_v18 = vmul.f32 %v4333_v19, %v5123_v60 }
 0x446   : > { %2553 = vmatpush.msrb.mxu0 %v2160_v20  ;;  %2573 = vmatpush.msrb.mxu1 %v2161_v55 }
 0x447   : > { %2759 = vmatmul.msk.f32.vlgmr.msrb.gmra.mxu2 %vm1561_vm5, %v4611_v39  ;;  %2760 = vmatmul.msk.f32.vlgmr.msrb.gmra.mxu3 %vm1561_vm5, %v4611_v39 }
 0x448   : > { %2554 = vmatpush.msrb.mxu0 %v2091_v17  ;;  %2574 = vmatpush.msrb.mxu1 %v2092_v11 }
 0x44a   : > { %2555 = vmatpush.msrb.mxu0 %v2022_v13  ;;  %2575 = vmatpush.msrb.mxu1 %v2023_v44 }
 0x44b   : > { %v2627_v16 = vpop.permute.xlu0 %2626 }
 0x44c   : > { %2556 = vmatpush.msrb.mxu0 %v1953_v23  ;;  %2576 = vmatpush.msrb.mxu1 %v1954_v15  ;;  %v2641_v43 = vpop.permute.xlu1 %2640 }
 0x44e   : > { %2557 = vmatpush.msrb.mxu0 %v1884_v26  ;;  %2577 = vmatpush.msrb.mxu1 %v1885_v25 }
 0x450   : > { %2558 = vmatpush.msrb.mxu0 %v1823_v35  ;;  %2578 = vmatpush.msrb.mxu1 %v1824_v18 }
 0x451   : > { %2757 = vmatmul.msk.f32.vlgmr.msrb.gmra.mxu0 %vm1561_vm5, %v4611_v39  ;;  %2758 = vmatmul.msk.f32.vlgmr.msrb.gmra.mxu1 %vm1561_vm5, %v4611_v39 }
 0x484   : > { %v2520_v51 = vpop.f32.mrf.mxu2 }
 0x485   : > { %v2631_v31 = vmul.f32 %v2627_v16, %v2520_v51 }
 0x487   : > { %v2645_v21 = vadd.f32 %v2641_v43, %v2631_v31 }
 0x489   : > { %v2653_v62 = vmax.f32 %v2645_v21, 0.0 }
 0x48b   : > { %2661 = vst [vmem:[%s4859_s17 + $0x10] sm:$0xff] %v2653_v62 }
 0x49a   : > { %v2540_v56 = vpop.f32.mrf.mxu3 }
 0x49b   : > { %v2632_v19 = vmul.f32 %v2627_v16, %v2540_v56 }
 0x49d   : > { %v2646_v39 = vadd.f32 %v2641_v43, %v2632_v19 }
 0x49f   : > { %v2654_v10 = vmax.f32 %v2646_v39, 0.0 }
 0x4a1   : > { %2662 = vst [vmem:[%s4859_s17 + $0x18] sm:$0xff] %v2654_v10 }
 0x4bc   : > { %v2480_v63 = vpop.f32.mrf.mxu0  ;;  %v2500_v1 = vpop.f32.mrf.mxu1 }
 0x4bd   : > { %v2629_v24 = vmul.f32 %v2627_v16, %v2480_v63  ;;  %v2630_v7 = vmul.f32 %v2627_v16, %v2500_v1 }
 0x4bf   : > { %v2643_v29 = vadd.f32 %v2641_v43, %v2629_v24  ;;  %v2644_v48 = vadd.f32 %v2641_v43, %v2630_v7 }
 0x4c1   : > { %v2651_v34 = vmax.f32 %v2643_v29, 0.0  ;;  %v2652_v52 = vmax.f32 %v2644_v48, 0.0 }
 0x4c3   : > { %2659 = vst [vmem:[%s4859_s17] sm:$0xff] %v2651_v34 }
 0x4c4   : > { %2660 = vst [vmem:[%s4859_s17 + $0x8] sm:$0xff] %v2652_v52 }
 0x4ca   : > { %v2600_v27 = vpop.f32.mrf.mxu2  ;;  %v2620_v4 = vpop.f32.mrf.mxu3 }
 0x4cb   : > { %v2635_v6 = vmul.f32 %v2627_v16, %v2600_v27  ;;  %v2636_v0 = vmul.f32 %v2627_v16, %v2620_v4 }
 0x4cd   : > { %v2649_v46 = vadd.f32 %v2641_v43, %v2635_v6  ;;  %v2650_v40 = vadd.f32 %v2641_v43, %v2636_v0 }
 0x4ce   : > { %v2560_v58 = vpop.f32.mrf.mxu0  ;;  %v2580_v22 = vpop.f32.mrf.mxu1 }
 0x4cf   : > { %v2657_v30 = vmax.f32 %v2649_v46, 0.0  ;;  %v2658_v45 = vmax.f32 %v2650_v40, 0.0  ;;  %v2633_v5 = vmul.f32 %v2627_v16, %v2560_v58  ;;  %v2634_v9 = vmul.f32 %v2627_v16, %v2580_v22 }
 0x4d1   : > { %2665 = vst [vmem:[%s4859_s17 + $0x30] sm:$0xff] %v2657_v30  ;;  %v2647_v53 = vadd.f32 %v2641_v43, %v2633_v5  ;;  %v2648_v8 = vadd.f32 %v2641_v43, %v2634_v9 }
 0x4d2   : > { %2666 = vst [vmem:[%s4859_s17 + $0x38] sm:$0xff] %v2658_v45 }
 0x4d3   : > { %v2655_v12 = vmax.f32 %v2647_v53, 0.0  ;;  %v2656_v57 = vmax.f32 %v2648_v8, 0.0 }
 0x4d5   : > { %2663 = vst [vmem:[%s4859_s17 + $0x20] sm:$0xff] %v2655_v12 }
 0x4d6   : > { %2664 = vst [vmem:[%s4859_s17 + $0x28] sm:$0xff] %v2656_v57 }
 0x4d7 PF: > { %s19_s30 = sadd.s32 1, %s3135_s30  }
 0x4d8   : > { %p16_p4 = scmp.ge.s32.totalorder %s19_s30, 4  }
 0x4da   :  { %18 = sbr.rel (!%p16_p4) target bundleno = 1 (0x1), region = 96 }

</bundles_post_ra>
